<compile_context>
chip_gen: v7x
topology: tpu7x:2x2x1
jax: 0.10.0
libtpu: 0.0.40
codegen_flags: <defaults>
</compile_context>

<pallas_src>
import functools
import math

import jax
import jax.numpy as jnp
from jax import lax
from jax.experimental import pallas as pl
from jax.experimental.pallas import tpu as pltpu

BN_EPS = 1e-5  # bn_eps / bn_momentum are globals in the source; forward uses batch stats.


def _round_up(x, m):
    return ((x + m - 1) // m) * m


# ---------------------------------------------------------------------------
# Fused kernel:  out = GraphConv( silu( x * bn_scale + bn_shift ) )
# ---------------------------------------------------------------------------
def _fused_bn_silu_graphconv_kernel(s_ref, x_ref, scale_ref, shift_ref, w_ref,
                                    o_ref):
    # s_ref:     (T, TM, N)  bf16  per-edge-type averaging rows for this tile
    # x_ref:     (N, C)      f32   raw node features (pre-norm), VMEM resident
    # scale_ref: (1, C)      f32   folded BatchNorm scale  gamma / sqrt(var+eps)
    # shift_ref: (1, C)      f32   folded BatchNorm shift  beta - mean*scale
    # w_ref:     (T, C, Op)  bf16  per-edge-type weights, Op padded to 128 lanes
    # o_ref:     (TM, Op)    f32   output rows for this tile (lane-dense store)
    h = x_ref[...] * scale_ref[...] + shift_ref[...]            # BN affine (VPU)
    h = h * pl.reciprocal(1.0 + jnp.exp(-h), approx=True)       # SiLU (EUP)
    h = h.astype(jnp.bfloat16)

    n_edge_type = s_ref.shape[0]

    def body(t, acc):
        # scatter-mean of neighbor features for edge type t: (TM, N) @ (N, C)
        col = jnp.dot(s_ref[t], h, preferred_element_type=jnp.float32)
        # this edge type's slice of the big weight matmul:   (TM, C) @ (C, Op)
        # (kept as (S@x)@W since C <= O here; flip the order if O < C)
        return acc + jnp.dot(col.astype(jnp.bfloat16), w_ref[t],
                             preferred_element_type=jnp.float32)

    o_ref[...] = lax.fori_loop(0, n_edge_type, body,
                               jnp.zeros(o_ref.shape, jnp.float32),
                               unroll=True)


def fused_bn_silu_graphconv(x, bn_scale, bn_shift, s3, weights, n_edge_type,
                            *, row_tile=128):
    """y = GraphConv(silu(x * bn_scale + bn_shift)) as a single pallas_call."""
    N, C = x.shape
    T = n_edge_type
    O = weights.shape[1]

    # Lane-dense output: pad out channels to a multiple of 128.
    Op = _round_up(O, 128)
    # Row tiling: 16-aligned (bf16 sublane packing), "parallel" grid axis.
    assert row_tile % 16 == 0
    TM = row_tile if N > row_tile else _round_up(N, 16)
    Np = _round_up(N, TM)
    num_tiles = Np // TM

    s3_bf16 = s3.astype(jnp.bfloat16)
    if Np != N:  # zero output rows, sliced off below
        s3_bf16 = jnp.pad(s3_bf16, ((0, 0), (0, Np - N), (0, 0)))
    w3 = weights.reshape(T, C, O)
    if Op != O:  # zero weight columns -> zero output columns, sliced off below
        w3 = jnp.pad(w3, ((0, 0), (0, 0), (0, Op - O)))
    w3 = w3.astype(jnp.bfloat16)

    cost = pl.CostEstimate(
        flops=int(2 * T * Np * N * C + 2 * T * Np * C * Op),
        transcendentals=int(num_tiles * N * C),
        bytes_accessed=int(2 * T * Np * N
                           + num_tiles * (4 * N * C + 2 * T * C * Op + 8 * C)
                           + 4 * Np * Op),
    )

    out = pl.pallas_call(
        _fused_bn_silu_graphconv_kernel,
        out_shape=jax.ShapeDtypeStruct((Np, Op), jnp.float32),
        grid=(num_tiles,),
        in_specs=[
            pl.BlockSpec((T, TM, N), lambda i: (0, i, 0)),    # S row tile
            pl.BlockSpec((N, C), lambda i: (0, 0)),           # x (resident)
            pl.BlockSpec((1, C), lambda i: (0, 0)),           # bn scale
            pl.BlockSpec((1, C), lambda i: (0, 0)),           # bn shift
            pl.BlockSpec((T, C, Op), lambda i: (0, 0, 0)),    # weights (resident)
        ],
        out_specs=pl.BlockSpec((TM, Op), lambda i: (i, 0)),
        compiler_params=pltpu.CompilerParams(
            dimension_semantics=("parallel",),
            vmem_limit_bytes=32 * 1024 * 1024),
        cost_estimate=cost,
    )(s3_bf16, x, bn_scale.reshape(1, C), bn_shift.reshape(1, C), w3)
    return out[:N, :O]


# ---------------------------------------------------------------------------
# Plain-JAX glue: BN statistics, edge averaging matrices, block composition.
# ---------------------------------------------------------------------------
def _bn_fold(x, gamma, beta, eps=BN_EPS):
    """BatchNorm1d forward (batch statistics) folded to a per-channel affine."""
    mean = jnp.mean(x, axis=0)
    var = jnp.mean(jnp.square(x - mean), axis=0)   # biased var, as in BN norm
    scale = gamma * lax.rsqrt(var + eps)
    shift = beta - mean * scale
    return scale, shift


def _build_edge_avg_matrices(edge_index, edge_type, num_nodes, n_edge_type):
    """S3[t, n, m]: averaging weight of source node m for (target n, type t);
    matches scatter_mean with empty buckets producing zeros."""
    row, col = edge_index[0], edge_index[1]
    counts = jnp.zeros((n_edge_type, num_nodes, num_nodes), jnp.float32)
    counts = counts.at[edge_type, row, col].add(1.0)
    bucket = jnp.sum(counts, axis=-1, keepdims=True)
    return counts / jnp.maximum(bucket, 1.0)


def graph_res_attn_block_forward(x, s3, blk, n_edge_type, *, row_tile=128):
    """One GraphResAttnBlock forward (temb=None path; dropout p=0 -> identity)."""
    # h = conv1(silu(norm1(x))) -- the norm affine + SiLU are fused into the kernel.
    sc1, sh1 = _bn_fold(x, blk["gamma1"], blk["beta1"])
    h = fused_bn_silu_graphconv(x, sc1, sh1, s3, blk["w_conv1"], n_edge_type,
                                row_tile=row_tile)
    # TODO(synk): temb_proj + MultiheadAttention(style) path not implemented
    #             (temb=None; the source forward also reads an undefined `emb`).
    # h = conv2(dropout(silu(norm2(h)))) ; dropout p=0.0 is identity.
    # TODO(synk): training-mode dropout (pltpu.prng_*) not implemented.
    sc2, sh2 = _bn_fold(h, blk["gamma2"], blk["beta2"])
    h = fused_bn_silu_graphconv(h, sc2, sh2, s3, blk["w_conv2"], n_edge_type,
                                row_tile=row_tile)
    # Shortcut: Conv1x1Bn when channel counts differ (tiny; plain-JAX glue).
    if "w_sc" in blk:
        skip = x @ blk["w_sc"]
        scs, shs = _bn_fold(skip, blk["gamma_sc"], blk["beta_sc"])
        x = skip * scs + shs
    return h + x


def graph_res_attn_blocks_forward(x, edge_index, edge_type, params,
                                  n_edge_type, *, row_tile=128):
    """GraphResAttnBlocks.forward (node_type=None, temb=None)."""
    # TODO(synk): n_node_type > 1 one-hot node-type concat path not implemented.
    s3 = _build_edge_avg_matrices(edge_index, edge_type, x.shape[0], n_edge_type)
    for blk in params:
        x = graph_res_attn_block_forward(x, s3, blk, n_edge_type,
                                         row_tile=row_tile)
    return x


# ---------------------------------------------------------------------------
# Parameter init (mirrors the PyTorch module's reset_parameters / defaults).
# ---------------------------------------------------------------------------
def _init_graphconv_weights(key, in_c, out_c, n_edge_type, avg_degree):
    fan_in = avg_degree * in_c
    fan_out = avg_degree * out_c
    std = math.sqrt(2.0 / float(fan_in + fan_out))
    a = math.sqrt(3.0) * std
    return jax.random.uniform(key, (n_edge_type * in_c, out_c), jnp.float32,
                              minval=-a, maxval=a)


def init_params(key, channel_in, channel_out, resblk_num, n_edge_type, avg_degree):
    channels = [channel_in] + [channel_out] * resblk_num
    params = []
    for i in range(resblk_num):
        c_in, c_out = channels[i], channels[i + 1]
        key, k1, k2, k3 = jax.random.split(key, 4)
        blk = {
            "gamma1": jnp.ones((c_in,), jnp.float32),
            "beta1": jnp.zeros((c_in,), jnp.float32),
            "w_conv1": _init_graphconv_weights(k1, c_in, c_out, n_edge_type, avg_degree),
            "gamma2": jnp.ones((c_out,), jnp.float32),
            "beta2": jnp.zeros((c_out,), jnp.float32),
            "w_conv2": _init_graphconv_weights(k2, c_out, c_out, n_edge_type, avg_degree),
        }
        if c_in != c_out:
            bound = 1.0 / math.sqrt(c_in)
            blk["w_sc"] = jax.random.uniform(k3, (c_in, c_out), jnp.float32,
                                             minval=-bound, maxval=bound)
            blk["gamma_sc"] = jnp.ones((c_out,), jnp.float32)
            blk["beta_sc"] = jnp.zeros((c_out,), jnp.float32)
        params.append(blk)
    return params


# ---------------------------------------------------------------------------
# Pure-JAX f32 reference matching the PyTorch forward semantics.
# ---------------------------------------------------------------------------
def _graphconv_ref(x, edge_index, edge_type, weights, n_edge_type):
    N, C = x.shape
    T = n_edge_type
    row, col = edge_index[0], edge_index[1]
    idx = row * T + edge_type
    summed = jnp.zeros((N * T, C), jnp.float32).at[idx].add(x[col])
    cnt = jnp.zeros((N * T,), jnp.float32).at[idx].add(1.0)
    col_data = summed / jnp.maximum(cnt, 1.0)[:, None]
    return col_data.reshape(N, T * C) @ weights


def _block_ref(x, edge_index, edge_type, blk, n_edge_type):
    sc1, sh1 = _bn_fold(x, blk["gamma1"], blk["beta1"])
    h = x * sc1 + sh1
    h = h / (1.0 + jnp.exp(-h))
    h = _graphconv_ref(h, edge_index, edge_type, blk["w_conv1"], n_edge_type)
    sc2, sh2 = _bn_fold(h, blk["gamma2"], blk["beta2"])
    h = h * sc2 + sh2
    h = h / (1.0 + jnp.exp(-h))
    h = _graphconv_ref(h, edge_index, edge_type, blk["w_conv2"], n_edge_type)
    if "w_sc" in blk:
        skip = x @ blk["w_sc"]
        scs, shs = _bn_fold(skip, blk["gamma_sc"], blk["beta_sc"])
        x = skip * scs + shs
    return h + x


def _reference_forward(x, edge_index, edge_type, params, n_edge_type):
    for blk in params:
        x = _block_ref(x, edge_index, edge_type, blk, n_edge_type)
    return x


if __name__ == "__main__":
    # Module config.
    channel_in = 8
    channel_out = 16
    resblk_num = 2
    dropout = 0.0          # p=0 -> identity (also matches eval mode)
    n_edge_type = 5
    avg_degree = 5
    n_node_type = 0        # no node-type one-hot concat

    num_nodes = 64
    num_edges = 256

    key = jax.random.PRNGKey(0)
    kx, ke1, ke2, ket, kp = jax.random.split(key, 5)

    x = jax.random.normal(kx, (num_nodes, channel_in), jnp.float32)
    edge_index = jnp.stack([
        jax.random.randint(ke1, (num_edges,), 0, num_nodes, dtype=jnp.int32),
        jax.random.randint(ke2, (num_edges,), 0, num_nodes, dtype=jnp.int32),
    ], axis=0)
    edge_type = jax.random.randint(ket, (num_edges,), 0, n_edge_type,
                                   dtype=jnp.int32)

    params = init_params(kp, channel_in, channel_out, resblk_num,
                         n_edge_type, avg_degree)

    # row_tile=32 -> 2 row tiles on the "parallel" grid axis at this toy size.
    forward = jax.jit(functools.partial(graph_res_attn_blocks_forward,
                                        n_edge_type=n_edge_type, row_tile=32))
    out = forward(x, edge_index, edge_type, params)
    out = jax.block_until_ready(out)

    ref = _reference_forward(x, edge_index, edge_type, params, n_edge_type)
    assert out.shape == (num_nodes, channel_out)
    rel_err = jnp.linalg.norm(out - ref) / (jnp.linalg.norm(ref) + 1e-8)
    assert float(rel_err) < 5e-2, f"relative error too large: {float(rel_err):.4f}"

    print("KERNEL_OK")
</pallas_src>

<mosaic_0001>
module attributes {stable_mosaic.version = 11 : i64} {
  func.func private @main(%arg0: i32) attributes {dimension_semantics = [#tpu.dimension_semantics<core_parallel>], iteration_bounds = array<i64: 2>, tpu.core_type = #tpu.core_type<sc_scalar_subcore>, window_params = []} {
    return
  }
}

module attributes {stable_mosaic.version = 11 : i64} {
  func.func private @main(%arg0: i32) attributes {dimension_semantics = [#tpu.dimension_semantics<core_parallel>], iteration_bounds = array<i64: 2>, tpu.core_type = #tpu.core_type<sc_scalar_subcore>, window_params = []} {
    return
  }
}

module attributes {stable_mosaic.version = 11 : i64} {
  func.func @_fused_bn_silu_graphconv_kernel(%arg0: i32, %arg1: memref<5x32x64xbf16, #tpu.memory_space<vmem>>, %arg2: memref<64x8xf32, #tpu.memory_space<vmem>>, %arg3: memref<1x8xf32, #tpu.memory_space<vmem>>, %arg4: memref<1x8xf32, #tpu.memory_space<vmem>>, %arg5: memref<5x8x128xbf16, #tpu.memory_space<vmem>>, %arg6: memref<32x128xf32, #tpu.memory_space<vmem>>) attributes {dimension_semantics = [#tpu.dimension_semantics<parallel>], iteration_bounds = array<i64: 2>, scalar_prefetch = 0 : i64, scratch_operands = 0 : i64, tpu.core_type = #tpu.core_type<tc>, window_params = [{transform_indices = @transform_0, window_bounds = array<i64: 5, 32, 64>}, {pipeline_mode = #tpu.pipeline_mode<synchronous>, transform_indices = @transform_1, window_bounds = array<i64: 64, 8>}, {pipeline_mode = #tpu.pipeline_mode<synchronous>, transform_indices = @transform_2, window_bounds = array<i64: 1, 8>}, {pipeline_mode = #tpu.pipeline_mode<synchronous>, transform_indices = @transform_3, window_bounds = array<i64: 1, 8>}, {pipeline_mode = #tpu.pipeline_mode<synchronous>, transform_indices = @transform_4, window_bounds = array<i64: 5, 8, 128>}, {transform_indices = @transform_5, window_bounds = array<i64: 32, 128>}]} {
    %c0 = arith.constant 0 : index
    %c0_0 = arith.constant 0 : index
    %0 = vector.load %arg2[%c0, %c0_0] : memref<64x8xf32, #tpu.memory_space<vmem>>, vector<64x8xf32>
    %c0_1 = arith.constant 0 : index
    %c0_2 = arith.constant 0 : index
    %1 = vector.load %arg3[%c0_1, %c0_2] : memref<1x8xf32, #tpu.memory_space<vmem>>, vector<1x8xf32>
    %2 = vector.broadcast %1 : vector<1x8xf32> to vector<64x8xf32>
    %3 = arith.mulf %0, %2 : vector<64x8xf32>
    %c0_3 = arith.constant 0 : index
    %c0_4 = arith.constant 0 : index
    %4 = vector.load %arg4[%c0_3, %c0_4] : memref<1x8xf32, #tpu.memory_space<vmem>>, vector<1x8xf32>
    %5 = vector.broadcast %4 : vector<1x8xf32> to vector<64x8xf32>
    %6 = arith.addf %3, %5 : vector<64x8xf32>
    %cst = arith.constant 0.000000e+00 : f32
    %7 = vector.broadcast %cst : f32 to vector<64x8xf32>
    %8 = arith.subf %7, %6 : vector<64x8xf32>
    %9 = math.exp %8 : vector<64x8xf32>
    %cst_5 = arith.constant 1.000000e+00 : f32
    %10 = vector.broadcast %cst_5 : f32 to vector<64x8xf32>
    %11 = arith.addf %10, %9 : vector<64x8xf32>
    %12 = tpu.reciprocal %11 {approx = true} : vector<64x8xf32> -> vector<64x8xf32>
    %13 = arith.mulf %6, %12 : vector<64x8xf32>
    %14 = arith.truncf %13 : vector<64x8xf32> to vector<64x8xbf16>
    %cst_6 = arith.constant 0.000000e+00 : f32
    %15 = vector.broadcast %cst_6 : f32 to vector<32x128xf32>
    %c0_i32 = arith.constant 0 : i32
    %16 = arith.index_cast %c0_i32 : i32 to index
    %c0_7 = arith.constant 0 : index
    %c0_8 = arith.constant 0 : index
    %17 = vector.load %arg1[%16, %c0_7, %c0_8] : memref<5x32x64xbf16, #tpu.memory_space<vmem>>, vector<1x32x64xbf16>
    %18 = vector.shape_cast %17 : vector<1x32x64xbf16> to vector<32x64xbf16>
    %cst_9 = arith.constant dense<0.000000e+00> : vector<32x8xf32>
    %19 = tpu.matmul %18, %14, %cst_9 {dimension_numbers = #tpu.dot_dimension_numbers<[1], [0], [0], [1], [0, 0, 1, 1], [], []>} : vector<32x64xbf16>, vector<64x8xbf16>, vector<32x8xf32> -> vector<32x8xf32>
    %20 = arith.truncf %19 : vector<32x8xf32> to vector<32x8xbf16>
    %21 = arith.index_cast %c0_i32 : i32 to index
    %c0_10 = arith.constant 0 : index
    %c0_11 = arith.constant 0 : index
    %22 = vector.load %arg5[%21, %c0_10, %c0_11] : memref<5x8x128xbf16, #tpu.memory_space<vmem>>, vector<1x8x128xbf16>
    %23 = vector.shape_cast %22 : vector<1x8x128xbf16> to vector<8x128xbf16>
    %cst_12 = arith.constant dense<0.000000e+00> : vector<32x128xf32>
    %24 = tpu.matmul %20, %23, %cst_12 {dimension_numbers = #tpu.dot_dimension_numbers<[1], [0], [0], [1], [0, 0, 1, 1], [], []>} : vector<32x8xbf16>, vector<8x128xbf16>, vector<32x128xf32> -> vector<32x128xf32>
    %25 = arith.addf %15, %24 : vector<32x128xf32>
    %c1_i32 = arith.constant 1 : i32
    %26 = arith.index_cast %c1_i32 : i32 to index
    %c0_13 = arith.constant 0 : index
    %c0_14 = arith.constant 0 : index
    %27 = vector.load %arg1[%26, %c0_13, %c0_14] : memref<5x32x64xbf16, #tpu.memory_space<vmem>>, vector<1x32x64xbf16>
    %28 = vector.shape_cast %27 : vector<1x32x64xbf16> to vector<32x64xbf16>
    %cst_15 = arith.constant dense<0.000000e+00> : vector<32x8xf32>
    %29 = tpu.matmul %28, %14, %cst_15 {dimension_numbers = #tpu.dot_dimension_numbers<[1], [0], [0], [1], [0, 0, 1, 1], [], []>} : vector<32x64xbf16>, vector<64x8xbf16>, vector<32x8xf32> -> vector<32x8xf32>
    %30 = arith.truncf %29 : vector<32x8xf32> to vector<32x8xbf16>
    %31 = arith.index_cast %c1_i32 : i32 to index
    %c0_16 = arith.constant 0 : index
    %c0_17 = arith.constant 0 : index
    %32 = vector.load %arg5[%31, %c0_16, %c0_17] : memref<5x8x128xbf16, #tpu.memory_space<vmem>>, vector<1x8x128xbf16>
    %33 = vector.shape_cast %32 : vector<1x8x128xbf16> to vector<8x128xbf16>
    %cst_18 = arith.constant dense<0.000000e+00> : vector<32x128xf32>
    %34 = tpu.matmul %30, %33, %cst_18 {dimension_numbers = #tpu.dot_dimension_numbers<[1], [0], [0], [1], [0, 0, 1, 1], [], []>} : vector<32x8xbf16>, vector<8x128xbf16>, vector<32x128xf32> -> vector<32x128xf32>
    %35 = arith.addf %25, %34 : vector<32x128xf32>
    %c2_i32 = arith.constant 2 : i32
    %36 = arith.index_cast %c2_i32 : i32 to index
    %c0_19 = arith.constant 0 : index
    %c0_20 = arith.constant 0 : index
    %37 = vector.load %arg1[%36, %c0_19, %c0_20] : memref<5x32x64xbf16, #tpu.memory_space<vmem>>, vector<1x32x64xbf16>
    %38 = vector.shape_cast %37 : vector<1x32x64xbf16> to vector<32x64xbf16>
    %cst_21 = arith.constant dense<0.000000e+00> : vector<32x8xf32>
    %39 = tpu.matmul %38, %14, %cst_21 {dimension_numbers = #tpu.dot_dimension_numbers<[1], [0], [0], [1], [0, 0, 1, 1], [], []>} : vector<32x64xbf16>, vector<64x8xbf16>, vector<32x8xf32> -> vector<32x8xf32>
    %40 = arith.truncf %39 : vector<32x8xf32> to vector<32x8xbf16>
    %41 = arith.index_cast %c2_i32 : i32 to index
    %c0_22 = arith.constant 0 : index
    %c0_23 = arith.constant 0 : index
    %42 = vector.load %arg5[%41, %c0_22, %c0_23] : memref<5x8x128xbf16, #tpu.memory_space<vmem>>, vector<1x8x128xbf16>
    %43 = vector.shape_cast %42 : vector<1x8x128xbf16> to vector<8x128xbf16>
    %cst_24 = arith.constant dense<0.000000e+00> : vector<32x128xf32>
    %44 = tpu.matmul %40, %43, %cst_24 {dimension_numbers = #tpu.dot_dimension_numbers<[1], [0], [0], [1], [0, 0, 1, 1], [], []>} : vector<32x8xbf16>, vector<8x128xbf16>, vector<32x128xf32> -> vector<32x128xf32>
    %45 = arith.addf %35, %44 : vector<32x128xf32>
    %c3_i32 = arith.constant 3 : i32
    %46 = arith.index_cast %c3_i32 : i32 to index
    %c0_25 = arith.constant 0 : index
    %c0_26 = arith.constant 0 : index
    %47 = vector.load %arg1[%46, %c0_25, %c0_26] : memref<5x32x64xbf16, #tpu.memory_space<vmem>>, vector<1x32x64xbf16>
    %48 = vector.shape_cast %47 : vector<1x32x64xbf16> to vector<32x64xbf16>
    %cst_27 = arith.constant dense<0.000000e+00> : vector<32x8xf32>
    %49 = tpu.matmul %48, %14, %cst_27 {dimension_numbers = #tpu.dot_dimension_numbers<[1], [0], [0], [1], [0, 0, 1, 1], [], []>} : vector<32x64xbf16>, vector<64x8xbf16>, vector<32x8xf32> -> vector<32x8xf32>
    %50 = arith.truncf %49 : vector<32x8xf32> to vector<32x8xbf16>
    %51 = arith.index_cast %c3_i32 : i32 to index
    %c0_28 = arith.constant 0 : index
    %c0_29 = arith.constant 0 : index
    %52 = vector.load %arg5[%51, %c0_28, %c0_29] : memref<5x8x128xbf16, #tpu.memory_space<vmem>>, vector<1x8x128xbf16>
    %53 = vector.shape_cast %52 : vector<1x8x128xbf16> to vector<8x128xbf16>
    %cst_30 = arith.constant dense<0.000000e+00> : vector<32x128xf32>
    %54 = tpu.matmul %50, %53, %cst_30 {dimension_numbers = #tpu.dot_dimension_numbers<[1], [0], [0], [1], [0, 0, 1, 1], [], []>} : vector<32x8xbf16>, vector<8x128xbf16>, vector<32x128xf32> -> vector<32x128xf32>
    %55 = arith.addf %45, %54 : vector<32x128xf32>
    %c4_i32 = arith.constant 4 : i32
    %56 = arith.index_cast %c4_i32 : i32 to index
    %c0_31 = arith.constant 0 : index
    %c0_32 = arith.constant 0 : index
    %57 = vector.load %arg1[%56, %c0_31, %c0_32] : memref<5x32x64xbf16, #tpu.memory_space<vmem>>, vector<1x32x64xbf16>
    %58 = vector.shape_cast %57 : vector<1x32x64xbf16> to vector<32x64xbf16>
    %cst_33 = arith.constant dense<0.000000e+00> : vector<32x8xf32>
    %59 = tpu.matmul %58, %14, %cst_33 {dimension_numbers = #tpu.dot_dimension_numbers<[1], [0], [0], [1], [0, 0, 1, 1], [], []>} : vector<32x64xbf16>, vector<64x8xbf16>, vector<32x8xf32> -> vector<32x8xf32>
    %60 = arith.truncf %59 : vector<32x8xf32> to vector<32x8xbf16>
    %61 = arith.index_cast %c4_i32 : i32 to index
    %c0_34 = arith.constant 0 : index
    %c0_35 = arith.constant 0 : index
    %62 = vector.load %arg5[%61, %c0_34, %c0_35] : memref<5x8x128xbf16, #tpu.memory_space<vmem>>, vector<1x8x128xbf16>
    %63 = vector.shape_cast %62 : vector<1x8x128xbf16> to vector<8x128xbf16>
    %cst_36 = arith.constant dense<0.000000e+00> : vector<32x128xf32>
    %64 = tpu.matmul %60, %63, %cst_36 {dimension_numbers = #tpu.dot_dimension_numbers<[1], [0], [0], [1], [0, 0, 1, 1], [], []>} : vector<32x8xbf16>, vector<8x128xbf16>, vector<32x128xf32> -> vector<32x128xf32>
    %65 = arith.addf %55, %64 : vector<32x128xf32>
    %c5_i32 = arith.constant 5 : i32
    %c0_37 = arith.constant 0 : index
    %c0_38 = arith.constant 0 : index
    %66 = vector.load %arg6[%c0_37, %c0_38] : memref<32x128xf32, #tpu.memory_space<vmem>>, vector<32x128xf32>
    tpu.vector_store %arg6[%c0_37, %c0_38], %65 {strides = array<i32>} : memref<32x128xf32, #tpu.memory_space<vmem>>, vector<32x128xf32>,
    return
  }
  func.func @transform_0(%arg0: i32) -> (i32, i32, i32) {
    %c0_i32 = arith.constant 0 : i32
    %c0_i32_0 = arith.constant 0 : i32
    %c0_i32_1 = arith.constant 0 : i32
    return %c0_i32, %arg0, %c0_i32_0 : i32, i32, i32
  }
  func.func @transform_1(%arg0: i32) -> (i32, i32) {
    %c0_i32 = arith.constant 0 : i32
    %c0_i32_0 = arith.constant 0 : i32
    %c0_i32_1 = arith.constant 0 : i32
    return %c0_i32, %c0_i32_0 : i32, i32
  }
  func.func @transform_2(%arg0: i32) -> (i32, i32) {
    %c0_i32 = arith.constant 0 : i32
    %c0_i32_0 = arith.constant 0 : i32
    %c0_i32_1 = arith.constant 0 : i32
    return %c0_i32, %c0_i32_0 : i32, i32
  }
  func.func @transform_3(%arg0: i32) -> (i32, i32) {
    %c0_i32 = arith.constant 0 : i32
    %c0_i32_0 = arith.constant 0 : i32
    %c0_i32_1 = arith.constant 0 : i32
    return %c0_i32, %c0_i32_0 : i32, i32
  }
  func.func @transform_4(%arg0: i32) -> (i32, i32, i32) {
    %c0_i32 = arith.constant 0 : i32
    %c0_i32_0 = arith.constant 0 : i32
    %c0_i32_1 = arith.constant 0 : i32
    %c0_i32_2 = arith.constant 0 : i32
    return %c0_i32, %c0_i32_0, %c0_i32_1 : i32, i32, i32
  }
  func.func @transform_5(%arg0: i32) -> (i32, i32) {
    %c0_i32 = arith.constant 0 : i32
    %c0_i32_0 = arith.constant 0 : i32
    return %arg0, %c0_i32 : i32, i32
  }
}

module attributes {stable_mosaic.version = 11 : i64} {
  func.func @_fused_bn_silu_graphconv_kernel(%arg0: i32, %arg1: memref<5x32x64xbf16, #tpu.memory_space<vmem>>, %arg2: memref<64x16xf32, #tpu.memory_space<vmem>>, %arg3: memref<1x16xf32, #tpu.memory_space<vmem>>, %arg4: memref<1x16xf32, #tpu.memory_space<vmem>>, %arg5: memref<5x16x128xbf16, #tpu.memory_space<vmem>>, %arg6: memref<32x128xf32, #tpu.memory_space<vmem>>) attributes {dimension_semantics = [#tpu.dimension_semantics<parallel>], iteration_bounds = array<i64: 2>, scalar_prefetch = 0 : i64, scratch_operands = 0 : i64, tpu.core_type = #tpu.core_type<tc>, window_params = [{transform_indices = @transform_0, window_bounds = array<i64: 5, 32, 64>}, {pipeline_mode = #tpu.pipeline_mode<synchronous>, transform_indices = @transform_1, window_bounds = array<i64: 64, 16>}, {pipeline_mode = #tpu.pipeline_mode<synchronous>, transform_indices = @transform_2, window_bounds = array<i64: 1, 16>}, {pipeline_mode = #tpu.pipeline_mode<synchronous>, transform_indices = @transform_3, window_bounds = array<i64: 1, 16>}, {pipeline_mode = #tpu.pipeline_mode<synchronous>, transform_indices = @transform_4, window_bounds = array<i64: 5, 16, 128>}, {transform_indices = @transform_5, window_bounds = array<i64: 32, 128>}]} {
    %c0 = arith.constant 0 : index
    %c0_0 = arith.constant 0 : index
    %0 = vector.load %arg2[%c0, %c0_0] : memref<64x16xf32, #tpu.memory_space<vmem>>, vector<64x16xf32>
    %c0_1 = arith.constant 0 : index
    %c0_2 = arith.constant 0 : index
    %1 = vector.load %arg3[%c0_1, %c0_2] : memref<1x16xf32, #tpu.memory_space<vmem>>, vector<1x16xf32>
    %2 = vector.broadcast %1 : vector<1x16xf32> to vector<64x16xf32>
    %3 = arith.mulf %0, %2 : vector<64x16xf32>
    %c0_3 = arith.constant 0 : index
    %c0_4 = arith.constant 0 : index
    %4 = vector.load %arg4[%c0_3, %c0_4] : memref<1x16xf32, #tpu.memory_space<vmem>>, vector<1x16xf32>
    %5 = vector.broadcast %4 : vector<1x16xf32> to vector<64x16xf32>
    %6 = arith.addf %3, %5 : vector<64x16xf32>
    %cst = arith.constant 0.000000e+00 : f32
    %7 = vector.broadcast %cst : f32 to vector<64x16xf32>
    %8 = arith.subf %7, %6 : vector<64x16xf32>
    %9 = math.exp %8 : vector<64x16xf32>
    %cst_5 = arith.constant 1.000000e+00 : f32
    %10 = vector.broadcast %cst_5 : f32 to vector<64x16xf32>
    %11 = arith.addf %10, %9 : vector<64x16xf32>
    %12 = tpu.reciprocal %11 {approx = true} : vector<64x16xf32> -> vector<64x16xf32>
    %13 = arith.mulf %6, %12 : vector<64x16xf32>
    %14 = arith.truncf %13 : vector<64x16xf32> to vector<64x16xbf16>
    %cst_6 = arith.constant 0.000000e+00 : f32
    %15 = vector.broadcast %cst_6 : f32 to vector<32x128xf32>
    %c0_i32 = arith.constant 0 : i32
    %16 = arith.index_cast %c0_i32 : i32 to index
    %c0_7 = arith.constant 0 : index
    %c0_8 = arith.constant 0 : index
    %17 = vector.load %arg1[%16, %c0_7, %c0_8] : memref<5x32x64xbf16, #tpu.memory_space<vmem>>, vector<1x32x64xbf16>
    %18 = vector.shape_cast %17 : vector<1x32x64xbf16> to vector<32x64xbf16>
    %cst_9 = arith.constant dense<0.000000e+00> : vector<32x16xf32>
    %19 = tpu.matmul %18, %14, %cst_9 {dimension_numbers = #tpu.dot_dimension_numbers<[1], [0], [0], [1], [0, 0, 1, 1], [], []>} : vector<32x64xbf16>, vector<64x16xbf16>, vector<32x16xf32> -> vector<32x16xf32>
    %20 = arith.truncf %19 : vector<32x16xf32> to vector<32x16xbf16>
    %21 = arith.index_cast %c0_i32 : i32 to index
    %c0_10 = arith.constant 0 : index
    %c0_11 = arith.constant 0 : index
    %22 = vector.load %arg5[%21, %c0_10, %c0_11] : memref<5x16x128xbf16, #tpu.memory_space<vmem>>, vector<1x16x128xbf16>
    %23 = vector.shape_cast %22 : vector<1x16x128xbf16> to vector<16x128xbf16>
    %cst_12 = arith.constant dense<0.000000e+00> : vector<32x128xf32>
    %24 = tpu.matmul %20, %23, %cst_12 {dimension_numbers = #tpu.dot_dimension_numbers<[1], [0], [0], [1], [0, 0, 1, 1], [], []>} : vector<32x16xbf16>, vector<16x128xbf16>, vector<32x128xf32> -> vector<32x128xf32>
    %25 = arith.addf %15, %24 : vector<32x128xf32>
    %c1_i32 = arith.constant 1 : i32
    %26 = arith.index_cast %c1_i32 : i32 to index
    %c0_13 = arith.constant 0 : index
    %c0_14 = arith.constant 0 : index
    %27 = vector.load %arg1[%26, %c0_13, %c0_14] : memref<5x32x64xbf16, #tpu.memory_space<vmem>>, vector<1x32x64xbf16>
    %28 = vector.shape_cast %27 : vector<1x32x64xbf16> to vector<32x64xbf16>
    %cst_15 = arith.constant dense<0.000000e+00> : vector<32x16xf32>
    %29 = tpu.matmul %28, %14, %cst_15 {dimension_numbers = #tpu.dot_dimension_numbers<[1], [0], [0], [1], [0, 0, 1, 1], [], []>} : vector<32x64xbf16>, vector<64x16xbf16>, vector<32x16xf32> -> vector<32x16xf32>
    %30 = arith.truncf %29 : vector<32x16xf32> to vector<32x16xbf16>
    %31 = arith.index_cast %c1_i32 : i32 to index
    %c0_16 = arith.constant 0 : index
    %c0_17 = arith.constant 0 : index
    %32 = vector.load %arg5[%31, %c0_16, %c0_17] : memref<5x16x128xbf16, #tpu.memory_space<vmem>>, vector<1x16x128xbf16>
    %33 = vector.shape_cast %32 : vector<1x16x128xbf16> to vector<16x128xbf16>
    %cst_18 = arith.constant dense<0.000000e+00> : vector<32x128xf32>
    %34 = tpu.matmul %30, %33, %cst_18 {dimension_numbers = #tpu.dot_dimension_numbers<[1], [0], [0], [1], [0, 0, 1, 1], [], []>} : vector<32x16xbf16>, vector<16x128xbf16>, vector<32x128xf32> -> vector<32x128xf32>
    %35 = arith.addf %25, %34 : vector<32x128xf32>
    %c2_i32 = arith.constant 2 : i32
    %36 = arith.index_cast %c2_i32 : i32 to index
    %c0_19 = arith.constant 0 : index
    %c0_20 = arith.constant 0 : index
    %37 = vector.load %arg1[%36, %c0_19, %c0_20] : memref<5x32x64xbf16, #tpu.memory_space<vmem>>, vector<1x32x64xbf16>
    %38 = vector.shape_cast %37 : vector<1x32x64xbf16> to vector<32x64xbf16>
    %cst_21 = arith.constant dense<0.000000e+00> : vector<32x16xf32>
    %39 = tpu.matmul %38, %14, %cst_21 {dimension_numbers = #tpu.dot_dimension_numbers<[1], [0], [0], [1], [0, 0, 1, 1], [], []>} : vector<32x64xbf16>, vector<64x16xbf16>, vector<32x16xf32> -> vector<32x16xf32>
    %40 = arith.truncf %39 : vector<32x16xf32> to vector<32x16xbf16>
    %41 = arith.index_cast %c2_i32 : i32 to index
    %c0_22 = arith.constant 0 : index
    %c0_23 = arith.constant 0 : index
    %42 = vector.load %arg5[%41, %c0_22, %c0_23] : memref<5x16x128xbf16, #tpu.memory_space<vmem>>, vector<1x16x128xbf16>
    %43 = vector.shape_cast %42 : vector<1x16x128xbf16> to vector<16x128xbf16>
    %cst_24 = arith.constant dense<0.000000e+00> : vector<32x128xf32>
    %44 = tpu.matmul %40, %43, %cst_24 {dimension_numbers = #tpu.dot_dimension_numbers<[1], [0], [0], [1], [0, 0, 1, 1], [], []>} : vector<32x16xbf16>, vector<16x128xbf16>, vector<32x128xf32> -> vector<32x128xf32>
    %45 = arith.addf %35, %44 : vector<32x128xf32>
    %c3_i32 = arith.constant 3 : i32
    %46 = arith.index_cast %c3_i32 : i32 to index
    %c0_25 = arith.constant 0 : index
    %c0_26 = arith.constant 0 : index
    %47 = vector.load %arg1[%46, %c0_25, %c0_26] : memref<5x32x64xbf16, #tpu.memory_space<vmem>>, vector<1x32x64xbf16>
    %48 = vector.shape_cast %47 : vector<1x32x64xbf16> to vector<32x64xbf16>
    %cst_27 = arith.constant dense<0.000000e+00> : vector<32x16xf32>
    %49 = tpu.matmul %48, %14, %cst_27 {dimension_numbers = #tpu.dot_dimension_numbers<[1], [0], [0], [1], [0, 0, 1, 1], [], []>} : vector<32x64xbf16>, vector<64x16xbf16>, vector<32x16xf32> -> vector<32x16xf32>
    %50 = arith.truncf %49 : vector<32x16xf32> to vector<32x16xbf16>
    %51 = arith.index_cast %c3_i32 : i32 to index
    %c0_28 = arith.constant 0 : index
    %c0_29 = arith.constant 0 : index
    %52 = vector.load %arg5[%51, %c0_28, %c0_29] : memref<5x16x128xbf16, #tpu.memory_space<vmem>>, vector<1x16x128xbf16>
    %53 = vector.shape_cast %52 : vector<1x16x128xbf16> to vector<16x128xbf16>
    %cst_30 = arith.constant dense<0.000000e+00> : vector<32x128xf32>
    %54 = tpu.matmul %50, %53, %cst_30 {dimension_numbers = #tpu.dot_dimension_numbers<[1], [0], [0], [1], [0, 0, 1, 1], [], []>} : vector<32x16xbf16>, vector<16x128xbf16>, vector<32x128xf32> -> vector<32x128xf32>
    %55 = arith.addf %45, %54 : vector<32x128xf32>
    %c4_i32 = arith.constant 4 : i32
    %56 = arith.index_cast %c4_i32 : i32 to index
    %c0_31 = arith.constant 0 : index
    %c0_32 = arith.constant 0 : index
    %57 = vector.load %arg1[%56, %c0_31, %c0_32] : memref<5x32x64xbf16, #tpu.memory_space<vmem>>, vector<1x32x64xbf16>
    %58 = vector.shape_cast %57 : vector<1x32x64xbf16> to vector<32x64xbf16>
    %cst_33 = arith.constant dense<0.000000e+00> : vector<32x16xf32>
    %59 = tpu.matmul %58, %14, %cst_33 {dimension_numbers = #tpu.dot_dimension_numbers<[1], [0], [0], [1], [0, 0, 1, 1], [], []>} : vector<32x64xbf16>, vector<64x16xbf16>, vector<32x16xf32> -> vector<32x16xf32>
    %60 = arith.truncf %59 : vector<32x16xf32> to vector<32x16xbf16>
    %61 = arith.index_cast %c4_i32 : i32 to index
    %c0_34 = arith.constant 0 : index
    %c0_35 = arith.constant 0 : index
    %62 = vector.load %arg5[%61, %c0_34, %c0_35] : memref<5x16x128xbf16, #tpu.memory_space<vmem>>, vector<1x16x128xbf16>
    %63 = vector.shape_cast %62 : vector<1x16x128xbf16> to vector<16x128xbf16>
    %cst_36 = arith.constant dense<0.000000e+00> : vector<32x128xf32>
    %64 = tpu.matmul %60, %63, %cst_36 {dimension_numbers = #tpu.dot_dimension_numbers<[1], [0], [0], [1], [0, 0, 1, 1], [], []>} : vector<32x16xbf16>, vector<16x128xbf16>, vector<32x128xf32> -> vector<32x128xf32>
    %65 = arith.addf %55, %64 : vector<32x128xf32>
    %c5_i32 = arith.constant 5 : i32
    %c0_37 = arith.constant 0 : index
    %c0_38 = arith.constant 0 : index
    %66 = vector.load %arg6[%c0_37, %c0_38] : memref<32x128xf32, #tpu.memory_space<vmem>>, vector<32x128xf32>
    tpu.vector_store %arg6[%c0_37, %c0_38], %65 {strides = array<i32>} : memref<32x128xf32, #tpu.memory_space<vmem>>, vector<32x128xf32>,
    return
  }
  func.func @transform_0(%arg0: i32) -> (i32, i32, i32) {
    %c0_i32 = arith.constant 0 : i32
    %c0_i32_0 = arith.constant 0 : i32
    %c0_i32_1 = arith.constant 0 : i32
    return %c0_i32, %arg0, %c0_i32_0 : i32, i32, i32
  }
  func.func @transform_1(%arg0: i32) -> (i32, i32) {
    %c0_i32 = arith.constant 0 : i32
    %c0_i32_0 = arith.constant 0 : i32
    %c0_i32_1 = arith.constant 0 : i32
    return %c0_i32, %c0_i32_0 : i32, i32
  }
  func.func @transform_2(%arg0: i32) -> (i32, i32) {
    %c0_i32 = arith.constant 0 : i32
    %c0_i32_0 = arith.constant 0 : i32
    %c0_i32_1 = arith.constant 0 : i32
    return %c0_i32, %c0_i32_0 : i32, i32
  }
  func.func @transform_3(%arg0: i32) -> (i32, i32) {
    %c0_i32 = arith.constant 0 : i32
    %c0_i32_0 = arith.constant 0 : i32
    %c0_i32_1 = arith.constant 0 : i32
    return %c0_i32, %c0_i32_0 : i32, i32
  }
  func.func @transform_4(%arg0: i32) -> (i32, i32, i32) {
    %c0_i32 = arith.constant 0 : i32
    %c0_i32_0 = arith.constant 0 : i32
    %c0_i32_1 = arith.constant 0 : i32
    %c0_i32_2 = arith.constant 0 : i32
    return %c0_i32, %c0_i32_0, %c0_i32_1 : i32, i32, i32
  }
  func.func @transform_5(%arg0: i32) -> (i32, i32) {
    %c0_i32 = arith.constant 0 : i32
    %c0_i32_0 = arith.constant 0 : i32
    return %arg0, %c0_i32 : i32, i32
  }
}

</mosaic_0001>

<bundles_post_ra>
// kernel: graph_res_attn_blocks_forward.4
= control target key start
LH: loop header
LB: loop body
LE: loop exit
PB: predicated region body
PF: predicated region fallthrough
CT: control target
= control target key end

     0   :  { %s1517_s18 = smov 0   ;;  %s1519_s19 = smov 0   ;;  %s1732_s0 = inlined_call_operand.vmem [shape: bf16[5,64,64], index: 0, kind: input, shape index: {}]   ;;  %s1733_s1 = inlined_call_operand.vmem [shape: f32[64,8], index: 1, kind: input, shape index: {}]   ;;  %s1734_s2 = inlined_call_operand.vmem [shape: f32[1,8], index: 2, kind: input, shape index: {}]   ;;  %s1735_s3 = inlined_call_operand.vmem [shape: f32[1,8], index: 3, kind: input, shape index: {}]   ;;  %s1736_s4 = inlined_call_operand.vmem [shape: bf16[5,8,128], index: 4, kind: input, shape index: {}]   ;;  %s1737_s5 = inlined_call_operand.vmem [shape: f32[64,128], index: 5, kind: output, shape index: {}]  }
   0x1   :  { %s1521_s20 = smov 0  }
   0x2 LB: > { %s1175_s21 = sadd.s32 4294967295, %s1485_s20   ;;  %s1534_s22 = sadd.s32 1, %s1485_s20   ;;  %s1485_s20 = sphi %s1521_s20, %s1740_s20   ;;  %s1481_s19 = sphi %s1519_s19, %s1739_s19   ;;  %s1477_s18 = sphi %s1517_s18, %s1738_s18  }
   0x3   : > { %s19_s23 = ssub.s32 %s1485_s20, %s1534_s22  ;;  %s22_s24 = sadd.s32 1, %s1481_s19 }
   0x4   : > { %p20_p0 = scmp.eq.s32.totalorder %s19_s23, 0  ;;  %p29_p1 = scmp.ne.s32.totalorder %s1481_s19, %s1477_s18 }
   0x5   : > { %p30_p2 = scmp.eq.s32.totalorder %s1485_s20, 0  ;;  %p1178_p4 = scmp.ge.s32.totalorder %s1485_s20, 2 }
   0x6   : > { %s1543_s25 = scalar_select %p20_p0, %s1481_s19, %s22_s24  }
   0x7   : > { %p31_p3 = por %p30_p2, %p29_p1  ;;  %177 = sbr.rel (%p1178_p4) target bundleno = 23 (0x17), region = 32 }
   0xe   : > { %180 = sbr.rel (!%p31_p3) target bundleno = 23 (0x17), region = 36  ;;  %s182_s26 = sand.u32 (%p31_p3), 1, %s1481_s19  }
   0xf   : > { %s1238_s27 = sshll.u32 (%p31_p3), %s1485_s20, 4  ;;  %s1395_s28 = smul.u32 (%p31_p3), 80, %s182_s26 }
  0x10   : > { %s187_s6 = scalar_lea.vmem (%p31_p3), %s1732_s0, %s1238_s27 }
  0x11   : > { %v203_v0 = vld [vmem:[%s187_s6] sm:$0xff] (%p31_p3)   ;;  %v207_v1 = vld [vmem:[%s187_s6 + $0x8] sm:$0xff] (%p31_p3)   ;;  %s184_s7 = scalar_lea.vmem (%p31_p3), [#allocation2], %s1395_s28 }
  0x12   : > { %v211_v2 = vld [vmem:[%s187_s6 + $0x20] sm:$0xff] (%p31_p3)   ;;  %v215_v3 = vld [vmem:[%s187_s6 + $0x28] sm:$0xff] (%p31_p3)   ;;  %204 = vst [vmem:[%s184_s7] sm:$0xff] (%p31_p3), %v203_v0   ;;  %208 = vst [vmem:[%s184_s7 + $0x8] sm:$0xff] (%p31_p3), %v207_v1  }
  0x13   : > { %v219_v4 = vld [vmem:[%s187_s6 + $0x40] sm:$0xff] (%p31_p3)   ;;  %v223_v5 = vld [vmem:[%s187_s6 + $0x48] sm:$0xff] (%p31_p3)   ;;  %212 = vst [vmem:[%s184_s7 + $0x10] sm:$0xff] (%p31_p3), %v211_v2   ;;  %216 = vst [vmem:[%s184_s7 + $0x18] sm:$0xff] (%p31_p3), %v215_v3  }
  0x14   : > { %220 = vst [vmem:[%s184_s7 + $0x20] sm:$0xff] (%p31_p3), %v219_v4   ;;  %224 = vst [vmem:[%s184_s7 + $0x28] sm:$0xff] (%p31_p3), %v223_v5   ;;  %v227_v6 = vld [vmem:[%s187_s6 + $0x60] sm:$0xff] (%p31_p3)   ;;  %v231_v7 = vld [vmem:[%s187_s6 + $0x68] sm:$0xff] (%p31_p3)  }
  0x15   : > { %v235_v8 = vld [vmem:[%s187_s6 + $0x80] sm:$0xff]   ;;  %228 = vst [vmem:[%s184_s7 + $0x30] sm:$0xff] %v227_v6   ;;  %232 = vst [vmem:[%s184_s7 + $0x38] sm:$0xff] %v231_v7   ;;  %v239_v9 = vld [vmem:[%s187_s6 + $0x88] sm:$0xff]  }
  0x16   : > { %236 = vst [vmem:[%s184_s7 + $0x40] sm:$0xff] %v235_v8   ;;  %240 = vst [vmem:[%s184_s7 + $0x48] sm:$0xff] %v239_v9  }
  0x17 PF: > { %p1181_p5 = scmp.ge.s32.totalorder %s1485_s20, 1  ;;  %p304_p6 = scmp.lt.s32.totalorder %s1485_s20, 3 }
  0x19   : > { %p305_p7 = pnand %p1181_p5, %p304_p6 }
  0x1a   : > { %v346_v10 = vld [vmem:[%s1733_s1] sm:$0xff] (!%p305_p7)  ;;  %v347_v11 = vld [vmem:[%s1733_s1 + $0x8] sm:$0xff] (!%p305_p7)  ;;  %s311_s14 = sand.u32 (!%p305_p7), 1, %s1477_s18   ;;  %v348_v16 = vld [vmem:[%s1733_s1 + $0x10] sm:$0xff] (!%p305_p7)  ;;  %vm450_vm0 = vcmask (!%p305_p7), 523264   ;;  %vm590_vm1 = vcmask (!%p305_p7), 1043456  }
  0x1b   : > { %308 = sbr.rel (%p305_p7) target bundleno = 801 (0x321), region = 77  ;;  %v1184_v12 = vld [vmem:[%s1734_s2] ss:$0 sm:$0xff] (!%p305_p7)  ;;  %v349_v17 = vld [vmem:[%s1733_s1 + $0x18] sm:$0xff] (!%p305_p7)  ;;  %v351_v21 = vld [vmem:[%s1733_s1 + $0x28] sm:$0xff] (!%p305_p7)  ;;  %vm583_vm2 = vcmask (!%p305_p7), 64512  }
  0x1c   : > { %v361_v13 = vmul.f32 (!%p305_p7), %v1184_v12, %v346_v10  ;;  %v362_v14 = vmul.f32 (!%p305_p7), %v1184_v12, %v347_v11  ;;  %v1185_v15 = vld [vmem:[%s1735_s3] ss:$0 sm:$0xff] (!%p305_p7)  ;;  %s1396_s27 = smul.u32 (!%p305_p7), 80, %s311_s14  ;;  %v363_v18 = vmul.f32 (!%p305_p7), %v1184_v12, %v348_v16  ;;  %v364_v19 = vmul.f32 (!%p305_p7), %v1184_v12, %v349_v17  ;;  %v352_v22 = vld [vmem:[%s1733_s1 + $0x30] sm:$0xff] (!%p305_p7)  ;;  %v353_v27 = vld [vmem:[%s1733_s1 + $0x38] sm:$0xff] (!%p305_p7) }
  0x1d   : > { %v350_v20 = vld [vmem:[%s1733_s1 + $0x20] sm:$0xff] (!%p305_p7)  ;;  %v366_v26 = vmul.f32 (!%p305_p7), %v1184_v12, %v351_v21  ;;  %v367_v30 = vmul.f32 (!%p305_p7), %v1184_v12, %v352_v22  ;;  %v368_v31 = vmul.f32 (!%p305_p7), %v1184_v12, %v353_v27 }
  0x1e   : > { %v1581_v23 = vadd.f32 (!%p305_p7), %v1185_v15, %v361_v13  ;;  %v1583_v24 = vadd.f32 (!%p305_p7), %v1185_v15, %v362_v14  ;;  %v365_v25 = vmul.f32 (!%p305_p7), %v1184_v12, %v350_v20  ;;  %v1588_v28 = vadd.f32 (!%p305_p7), %v1185_v15, %v363_v18  ;;  %s1592_s10 = scalar_lea.vmem (!%p305_p7), [#allocation2], %s1396_s27  ;;  %s1182_s27 = sshll.u32 (!%p305_p7), %s1175_s21, 2 }
  0x1f   : > { %v1590_v29 = vadd.f32 (!%p305_p7), %v1185_v15, %v364_v19  ;;  %v1421_v32 = vld [vmem:[%s1592_s10] sm:$0xff] (!%p305_p7)   ;;  %v1597_v36 = vadd.f32 (!%p305_p7), %v1185_v15, %v366_v26  ;;  %v1601_v39 = vadd.f32 (!%p305_p7), %v1185_v15, %v367_v30  ;;  %v1603_v40 = vadd.f32 (!%p305_p7), %v1185_v15, %v368_v31  ;;  %v1423_v26 = vld [vmem:[%s1592_s10 + $0x10] sm:$0xff] (!%p305_p7)   ;;  %v1424_v27 = vld [vmem:[%s1592_s10 + $0x18] sm:$0xff] (!%p305_p7)   ;;  %p340_p8 = scmp.lt.s32.totalorder (!%p305_p7), %s1182_s27, 7 }
  0x20   : > { %v384_v33 = vsub.f32 (!%p305_p7), 0.0, %v1581_v23  ;;  %v385_v34 = vsub.f32 (!%p305_p7), 0.0, %v1583_v24  ;;  %v380_v35 = vadd.f32 (!%p305_p7), %v1185_v15, %v365_v25  ;;  %v386_v37 = vsub.f32 (!%p305_p7), 0.0, %v1588_v28  ;;  %1292 = vmatprep.mubr.msk.bf16.mxu1 (!%p305_p7), %vm450_vm0, %v1421_v32  ;;  %v1422_v25 = vld [vmem:[%s1592_s10 + $0x8] sm:$0xff] (!%p305_p7)   ;;  %v1427_v30 = vld [vmem:[%s1592_s10 + $0x30] sm:$0xff] (!%p305_p7)   ;;  %v1428_v31 = vld [vmem:[%s1592_s10 + $0x38] sm:$0xff] (!%p305_p7)  }
  0x21   : > { %v387_v38 = vsub.f32 (!%p305_p7), 0.0, %v1590_v29  ;;  %v389_v44 = vsub.f32 (!%p305_p7), 0.0, %v1597_v36  ;;  %v390_v47 = vsub.f32 (!%p305_p7), 0.0, %v1601_v39  ;;  %v391_v48 = vsub.f32 (!%p305_p7), 0.0, %v1603_v40  ;;  %v1198_v32 = vld [vmem:[%s1736_s4 + $0x4] sm:$0xf] (!%p305_p7) }
  0x22   : > { %v392_v41 = vmul.f32 1.442695, %v384_v33  ;;  %v394_v42 = vmul.f32 1.442695, %v385_v34  ;;  %v388_v43 = vsub.f32 0.0, %v380_v35  ;;  %1390 = vmatprep.subr.msk.bf16.mxu0 %vm590_vm1, %v1198_v32  ;;  %v592_v33 = vsel %vm590_vm1, %v1198_v32, 0 }
  0x23   : > { %v396_v45 = vmul.f32 1.442695, %v386_v37  ;;  %v398_v46 = vmul.f32 1.442695, %v387_v38  ;;  %v402_v50 = vmul.f32 1.442695, %v389_v44  ;;  %1309 = vmatpush3.bf16.msra.mxu0 %v592_v33 }
  0x24   : > { %1431 = vpow2.f32 %v392_v41  ;;  %v400_v49 = vmul.f32 1.442695, %v388_v43  ;;  %v404_v51 = vmul.f32 1.442695, %v390_v47  ;;  %v406_v52 = vmul.f32 1.442695, %v391_v48 }
  0x25   : > { %1433 = vpow2.f32 %v394_v42  ;;  %v508_v34 = vld [vmem:[%s1736_s4] sm:$0xf]  ;;  %v1211_v48 = vld [vmem:[%s1736_s4 + $0x8] sm:$0xf]  ;;  %s1742_s27 = smov (!%p340_p8, %s1182_s27), 7 }
  0x26   : > { %1435 = vpow2.f32 %v396_v45  ;;  %1391 = vmatprep.subr.msk.bf16.mxu0 %vm590_vm1, %v508_v34  ;;  %v650_v47 = vsel %vm590_vm1, %v508_v34, 0  ;;  %s1183_s28 = sshll.u32 %s1742_s27, 3 }
  0x27   : > { %1437 = vpow2.f32 %v398_v46  ;;  %s343_s30 = scalar_lea.vmem %s1737_s5, %s1183_s28 }
  0x28   : > { %1439 = vpow2.f32 %v400_v49 }
  0x29   : > { %1441 = vpow2.f32 %v402_v50 }
  0x2a   : > { %1443 = vpow2.f32 %v404_v51  ;;  %v782_v51 = vsel %vm590_vm1, %v1211_v48, 0 }
  0x2b   : > { %1445 = vpow2.f32 %v406_v52 }
  0x2e   : > { %v1432_v53 = vpop.eup %1431 }
  0x2f   : > { %v1434_v54 = vpop.eup %1433  ;;  %v408_v55 = vadd.f32 1.0, %v1432_v53  ;;  %v1222_v53 = vld [vmem:[%s1736_s4 + $0xc] sm:$0xf] }
  0x30   : > { %v1436_v56 = vpop.eup %1435  ;;  %v409_v57 = vadd.f32 1.0, %v1434_v54 }
  0x31   : > { %v1438_v58 = vpop.eup %1437  ;;  %1447 = vrcp.f32 %v408_v55  ;;  %v410_v59 = vadd.f32 1.0, %v1436_v56 }
  0x32   : > { %v1440_v60 = vpop.eup %1439  ;;  %1449 = vrcp.f32 %v409_v57  ;;  %v411_v61 = vadd.f32 1.0, %v1438_v58  ;;  %v918_v57 = vsel %vm590_vm1, %v1222_v53, 0 }
  0x33   : > { %v1442_v62 = vpop.eup %1441  ;;  %1451 = vrcp.f32 %v410_v59  ;;  %v412_v63 = vadd.f32 1.0, %v1440_v60 }
  0x34   : > { %v1444_v0 = vpop.eup %1443  ;;  %1453 = vrcp.f32 %v411_v61  ;;  %v413_v1 = vadd.f32 1.0, %v1442_v62 }
  0x35   : > { %v1446_v2 = vpop.eup %1445  ;;  %1455 = vrcp.f32 %v412_v63  ;;  %v414_v3 = vadd.f32 1.0, %v1444_v0  ;;  %v1429_v0 = vld [vmem:[%s1592_s10 + $0x40] sm:$0xff]  }
  0x36   : > { %1457 = vrcp.f32 %v413_v1  ;;  %v415_v4 = vadd.f32 1.0, %v1446_v2  ;;  %v1233_v1 = vld [vmem:[%s1736_s4 + $0x10] sm:$0xf] }
  0x37   : > { %1459 = vrcp.f32 %v414_v3  ;;  %v1430_v2 = vld [vmem:[%s1592_s10 + $0x48] sm:$0xff]   ;;  %v1054_v3 = vsel %vm590_vm1, %v1233_v1, 0 }
  0x38   : > { %1461 = vrcp.f32 %v415_v4 }
  0x3b   : > { %v1448_v5 = vpop.eup %1447 }
  0x3c   : > { %v1450_v6 = vpop.eup %1449  ;;  %v424_v7 = vmul.f32 %v1448_v5, %v1581_v23 }
  0x3d   : > { %v1452_v8 = vpop.eup %1451  ;;  %v425_v9 = vmul.f32 %v1450_v6, %v1583_v24 }
  0x3e   : > { %v1454_v10 = vpop.eup %1453  ;;  %v426_v11 = vmul.f32 %v1452_v8, %v1588_v28  ;;  %v1425_v28 = vld [vmem:[%s1592_s10 + $0x20] sm:$0xff]  }
  0x3f   : > { %v1456_v12 = vpop.eup %1455  ;;  %v1612_v13 = vpack.c.bf16 %v425_v9, %v424_v7  ;;  %v427_v14 = vmul.f32 %v1454_v10, %v1590_v29  ;;  %v1426_v29 = vld [vmem:[%s1592_s10 + $0x28] sm:$0xff]  }
  0x40   : > { %v1458_v15 = vpop.eup %1457  ;;  %v428_v16 = vmul.f32 %v1456_v12, %v380_v35 }
  0x41   : > { %v1460_v17 = vpop.eup %1459  ;;  %1284 = vmatprep.subr.bf16.mxu1 %v1612_v13  ;;  %v1616_v18 = vpack.c.bf16 %v427_v14, %v426_v11  ;;  %v429_v19 = vmul.f32 %v1458_v15, %v1597_v36 }
  0x42   : > { %v1462_v20 = vpop.eup %1461  ;;  %1285 = vmatpush3.bf16.msra.mxu1 %v1612_v13  ;;  %v430_v22 = vmul.f32 %v1460_v17, %v1601_v39 }
  0x43   : > { %1286 = vmatprep.subr.bf16.mxu1 %v1616_v18  ;;  %v1621_v21 = vpack.c.bf16 %v429_v19, %v428_v16  ;;  %v431_v23 = vmul.f32 %v1462_v20, %v1603_v40 }
  0x45   : > { %v1627_v24 = vpack.c.bf16 %v431_v23, %v430_v22 }
  0x46   : > { %1287 = vmatpush3.bf16.msra.mxu1 %v1616_v18 }
  0x47   : > { %1288 = vmatprep.subr.bf16.mxu1 %v1621_v21 }
  0x4a   : > { %1289 = vmatpush3.bf16.msra.mxu1 %v1621_v21 }
  0x4b   : > { %1290 = vmatprep.subr.bf16.mxu1 %v1627_v24 }
  0x4e   : > { %1291 = vmatpush3.bf16.msra.mxu1 %v1627_v24 }
  0x4f   : > { %1296 = vmatprep.subr.bf16.mxu1 %v1612_v13 }
  0x51   : > { %1293 = vmatmul.mubr.msk.bf16.vlgmr.msra.gmra.mrb[0].mxu1 %vm450_vm0, %v1422_v25 }
  0x52   : > { %1297 = vmatpush3.bf16.msra.mxu1 %v1612_v13  ;;  %1304 = vmatprep.mubr.msk.bf16.mxu1 %vm450_vm0, %v1423_v26 }
  0x53   : > { %1298 = vmatprep.subr.bf16.mxu1 %v1616_v18 }
  0x56   : > { %1299 = vmatpush3.bf16.msra.mxu1 %v1616_v18 }
  0x57   : > { %1300 = vmatprep.subr.bf16.mxu1 %v1621_v21 }
  0x5a   : > { %1301 = vmatpush3.bf16.msra.mxu1 %v1621_v21 }
  0x5b   : > { %1302 = vmatprep.subr.bf16.mxu1 %v1627_v24 }
  0x5e   : > { %1303 = vmatpush3.bf16.msra.mxu1 %v1627_v24 }
  0x5f   : > { %1320 = vmatprep.subr.bf16.mxu1 %v1612_v13 }
  0x61   : > { %1305 = vmatmul.mubr.msk.bf16.vlgmr.msra.gmra.mrb[4].mxu1 %vm450_vm0, %v1424_v27 }
  0x62   : > { %1321 = vmatpush3.bf16.msra.mxu1 %v1612_v13  ;;  %1328 = vmatprep.mubr.msk.bf16.mxu1 %vm450_vm0, %v1425_v28 }
  0x63   : > { %1322 = vmatprep.subr.bf16.mxu1 %v1616_v18 }
  0x66   : > { %1323 = vmatpush3.bf16.msra.mxu1 %v1616_v18 }
  0x67   : > { %1324 = vmatprep.subr.bf16.mxu1 %v1621_v21 }
  0x6a   : > { %1325 = vmatpush3.bf16.msra.mxu1 %v1621_v21 }
  0x6b   : > { %1326 = vmatprep.subr.bf16.mxu1 %v1627_v24 }
  0x6e   : > { %1327 = vmatpush3.bf16.msra.mxu1 %v1627_v24 }
  0x6f   : > { %1338 = vmatprep.subr.bf16.mxu1 %v1612_v13 }
  0x71   : > { %1329 = vmatmul.mubr.msk.bf16.vlgmr.msra.gmra.mrb[8].mxu1 %vm450_vm0, %v1426_v29 }
  0x72   : > { %1339 = vmatpush3.bf16.msra.mxu1 %v1612_v13  ;;  %1346 = vmatprep.mubr.msk.bf16.mxu1 %vm450_vm0, %v1427_v30 }
  0x73   : > { %1340 = vmatprep.subr.bf16.mxu1 %v1616_v18 }
  0x76   : > { %1341 = vmatpush3.bf16.msra.mxu1 %v1616_v18 }
  0x77   : > { %1342 = vmatprep.subr.bf16.mxu1 %v1621_v21 }
  0x7a   : > { %1343 = vmatpush3.bf16.msra.mxu1 %v1621_v21 }
  0x7b   : > { %1344 = vmatprep.subr.bf16.mxu1 %v1627_v24 }
  0x7e   : > { %1345 = vmatpush3.bf16.msra.mxu1 %v1627_v24 }
  0x81   : > { %1347 = vmatmul.mubr.msk.bf16.vlgmr.msra.gmra.mrb[12].mxu1 %vm450_vm0, %v1428_v31 }
 0x124   : > { %v1294_v35 = vpop.f32.mrb[0].mxu1 }
 0x125   : > { %v491_v36 = vpop.f32.mrb[1].mxu1 }
 0x126   : > { %v1295_v37 = vpop.f32.mrb[2].mxu1 }
 0x127   : > { %v507_v38 = vpack.c.bf16 %v1295_v37, %v1294_v35  ;;  %v494_v39 = vpop.f32.mrb[3].mxu1 }
 0x128   : > { %v506_v40 = vpack.c.bf16 %v494_v39, %v491_v36 }
 0x134   : > { %v1306_v41 = vpop.f32.mrb[4].mxu1 }
 0x135   : > { %v564_v42 = vpop.f32.mrb[5].mxu1 }
 0x136   : > { %v1307_v43 = vpop.f32.mrb[6].mxu1 }
 0x137   : > { %v580_v44 = vpack.c.bf16 %v1307_v43, %v1306_v41  ;;  %v567_v45 = vpop.f32.mrb[7].mxu1 }
 0x138   : > { %v579_v46 = vpack.c.bf16 %v567_v45, %v564_v42 }
 0x13a   : > { %1310 = vmatprep.mubr.msk.bf16.mxu0 %vm583_vm2, %v579_v46 }
 0x13b   : > { %1311 = vmatmul.mubr.msk.bf16.vlgmr.msra.gmra.mrb[0].mxu0 %vm583_vm2, %v580_v44 }
 0x13c   : > { %1315 = vmatpush3.bf16.msra.mxu0 %v650_v47  ;;  %1316 = vmatprep.mubr.msk.bf16.mxu0 %vm583_vm2, %v506_v40 }
 0x13d   : > { %1392 = vmatprep.subr.msk.bf16.mxu0 %vm590_vm1, %v1211_v48 }
 0x144   : > { %v1330_v49 = vpop.f32.mrb[8].mxu1 }
 0x145   : > { %v756_v50 = vpop.f32.mrb[9].mxu1 }
 0x146   : > { %v1331_v52 = vpop.f32.mrb[10].mxu1 }
 0x147   : > { %1317 = vmatmul.mubr.msk.bf16.vlgmr.msra.gmra.mrb[0].mxu0 %vm583_vm2, %v507_v38  ;;  %v772_v54 = vpack.c.bf16 %v1331_v52, %v1330_v49  ;;  %v759_v55 = vpop.f32.mrb[11].mxu1 }
 0x148   : > { %1333 = vmatpush3.bf16.msra.mxu0 %v782_v51  ;;  %v771_v56 = vpack.c.bf16 %v759_v55, %v756_v50 }
 0x149   : > { %1393 = vmatprep.subr.msk.bf16.mxu0 %vm590_vm1, %v1222_v53 }
 0x14a   : > { %1334 = vmatprep.mubr.msk.bf16.mxu0 %vm583_vm2, %v771_v56 }
 0x153   : > { %1335 = vmatmul.mubr.msk.bf16.vlgmr.msra.gmra.mrb[0].mxu0 %vm583_vm2, %v772_v54 }
 0x154   : > { %1351 = vmatpush3.bf16.msra.mxu0 %v918_v57  ;;  %v1348_v58 = vpop.f32.mrb[12].mxu1 }
 0x155   : > { %v892_v59 = vpop.f32.mrb[13].mxu1  ;;  %1356 = vmatprep.subr.bf16.mxu0 %v1612_v13 }
 0x156   : > { %v1349_v60 = vpop.f32.mrb[14].mxu1 }
 0x157   : > { %v908_v61 = vpack.c.bf16 %v1349_v60, %v1348_v58  ;;  %v895_v62 = vpop.f32.mrb[15].mxu1 }
 0x158   : > { %v907_v63 = vpack.c.bf16 %v895_v62, %v892_v59 }
 0x15a   : > { %1352 = vmatprep.mubr.msk.bf16.mxu0 %vm583_vm2, %v907_v63 }
 0x15f   : > { %1353 = vmatmul.mubr.msk.bf16.vlgmr.msra.gmra.mrb[0].mxu0 %vm583_vm2, %v908_v61 }
 0x160   : > { %1357 = vmatpush3.bf16.msra.mxu0 %v1612_v13  ;;  %1364 = vmatprep.mubr.msk.bf16.mxu0 %vm450_vm0, %v1429_v0 }
 0x161   : > { %1358 = vmatprep.subr.bf16.mxu0 %v1616_v18 }
 0x164   : > { %1359 = vmatpush3.bf16.msra.mxu0 %v1616_v18 }
 0x165   : > { %1360 = vmatprep.subr.bf16.mxu0 %v1621_v21 }
 0x168   : > { %1361 = vmatpush3.bf16.msra.mxu0 %v1621_v21 }
 0x169   : > { %1362 = vmatprep.subr.bf16.mxu0 %v1627_v24 }
 0x16c   : > { %1363 = vmatpush3.bf16.msra.mxu0 %v1627_v24 }
 0x16d   : > { %1394 = vmatprep.subr.msk.bf16.mxu0 %vm590_vm1, %v1233_v1 }
 0x16f   : > { %1365 = vmatmul.mubr.msk.bf16.vlgmr.msra.gmra.mrb[4].mxu0 %vm450_vm0, %v1430_v2 }
 0x170   : > { %1369 = vmatpush3.bf16.msra.mxu0 %v1054_v3 }
 0x242   : > { %v1366_v4 = vpop.f32.mrb[4].mxu0 }
 0x243   : > { %v1028_v5 = vpop.f32.mrb[5].mxu0 }
 0x244   : > { %v1367_v6 = vpop.f32.mrb[6].mxu0 }
 0x245   : > { %v1044_v7 = vpack.c.bf16 %v1367_v6, %v1366_v4  ;;  %v1031_v8 = vpop.f32.mrb[7].mxu0 }
 0x246   : > { %v1043_v9 = vpack.c.bf16 %v1031_v8, %v1028_v5 }
 0x248   : > { %1370 = vmatprep.mubr.msk.bf16.mxu0 %vm583_vm2, %v1043_v9 }
 0x249   : > { %1371 = vmatmul.mubr.msk.bf16.vlgmr.msra.gmra.mrb[0].mxu0 %vm583_vm2, %v1044_v7 }
 0x31c   : > { %v1372_v10 = vpop.f32.mrb[0].mxu0 }
 0x31d   : > { %v1090_v11 = vpop.f32.mrb[1].mxu0  ;;  %1111 = vst [vmem:[%s343_s30 + $0x10] sm:$0xff] %v1372_v10 }
 0x31e   : > { %1109 = vst [vmem:[%s343_s30] sm:$0xff] %v1090_v11  ;;  %v1373_v12 = vpop.f32.mrb[2].mxu0 }
 0x31f   : > { %v1093_v13 = vpop.f32.mrb[3].mxu0  ;;  %1112 = vst [vmem:[%s343_s30 + $0x18] sm:$0xff] %v1373_v12 }
 0x320   : > { %1110 = vst [vmem:[%s343_s30 + $0x8] sm:$0xff] %v1093_v13 }
 0x321 PF: > { %p12_p9 = scmp.ge.s32.totalorder %s1534_s22, 4   ;;  %s1738_s18 = smov %s1481_s19 }
 0x322   : > { %s1739_s19 = smov %s1543_s25  ;;  %s1740_s20 = smov %s1534_s22 }
 0x323   :  { %14 = sbr.rel (!%p12_p9) target bundleno = 2 (0x2), region = 124 }

// kernel: graph_res_attn_blocks_forward.5
= control target key start
LH: loop header
LB: loop body
LE: loop exit
PB: predicated region body
PF: predicated region fallthrough
CT: control target
= control target key end

     0   :  { %s1545_s18 = smov 0   ;;  %s1547_s19 = smov 0   ;;  %s1750_s0 = inlined_call_operand.vmem [shape: bf16[5,64,64], index: 0, kind: input, shape index: {}]   ;;  %s1751_s1 = inlined_call_operand.vmem [shape: f32[64,16], index: 1, kind: input, shape index: {}]   ;;  %s1752_s2 = inlined_call_operand.vmem [shape: f32[1,16], index: 2, kind: input, shape index: {}]   ;;  %s1753_s3 = inlined_call_operand.vmem [shape: f32[1,16], index: 3, kind: input, shape index: {}]   ;;  %s1754_s4 = inlined_call_operand.vmem [shape: bf16[5,16,128], index: 4, kind: input, shape index: {}]   ;;  %s1755_s5 = inlined_call_operand.vmem [shape: f32[64,128], index: 5, kind: output, shape index: {}]  }
   0x1   :  { %s1549_s20 = smov 0  }
   0x2 LB: > { %s1194_s21 = sadd.s32 4294967295, %s1513_s20   ;;  %s1562_s22 = sadd.s32 1, %s1513_s20   ;;  %s1513_s20 = sphi %s1549_s20, %s1758_s20   ;;  %s1509_s19 = sphi %s1547_s19, %s1757_s19   ;;  %s1505_s18 = sphi %s1545_s18, %s1756_s18  }
   0x3   : > { %s19_s23 = ssub.s32 %s1513_s20, %s1562_s22  ;;  %s22_s24 = sadd.s32 1, %s1509_s19 }
   0x4   : > { %p20_p0 = scmp.eq.s32.totalorder %s19_s23, 0  ;;  %p29_p1 = scmp.ne.s32.totalorder %s1509_s19, %s1505_s18 }
   0x5   : > { %p30_p2 = scmp.eq.s32.totalorder %s1513_s20, 0  ;;  %p1197_p4 = scmp.ge.s32.totalorder %s1513_s20, 2 }
   0x6   : > { %s1571_s25 = scalar_select %p20_p0, %s1509_s19, %s22_s24  }
   0x7   : > { %p31_p3 = por %p30_p2, %p29_p1  ;;  %177 = sbr.rel (%p1197_p4) target bundleno = 23 (0x17), region = 32 }
   0xe   : > { %180 = sbr.rel (!%p31_p3) target bundleno = 23 (0x17), region = 36  ;;  %s182_s26 = sand.u32 (%p31_p3), 1, %s1509_s19  }
   0xf   : > { %s1266_s27 = sshll.u32 (%p31_p3), %s1513_s20, 4  ;;  %s1418_s28 = smul.u32 (%p31_p3), 80, %s182_s26 }
  0x10   : > { %s187_s6 = scalar_lea.vmem (%p31_p3), %s1750_s0, %s1266_s27 }
  0x11   : > { %v203_v0 = vld [vmem:[%s187_s6] sm:$0xff] (%p31_p3)   ;;  %v207_v1 = vld [vmem:[%s187_s6 + $0x8] sm:$0xff] (%p31_p3)   ;;  %s184_s7 = scalar_lea.vmem (%p31_p3), [#allocation2], %s1418_s28 }
  0x12   : > { %v211_v2 = vld [vmem:[%s187_s6 + $0x20] sm:$0xff] (%p31_p3)   ;;  %v215_v3 = vld [vmem:[%s187_s6 + $0x28] sm:$0xff] (%p31_p3)   ;;  %204 = vst [vmem:[%s184_s7] sm:$0xff] (%p31_p3), %v203_v0   ;;  %208 = vst [vmem:[%s184_s7 + $0x8] sm:$0xff] (%p31_p3), %v207_v1  }
  0x13   : > { %v219_v4 = vld [vmem:[%s187_s6 + $0x40] sm:$0xff] (%p31_p3)   ;;  %v223_v5 = vld [vmem:[%s187_s6 + $0x48] sm:$0xff] (%p31_p3)   ;;  %212 = vst [vmem:[%s184_s7 + $0x10] sm:$0xff] (%p31_p3), %v211_v2   ;;  %216 = vst [vmem:[%s184_s7 + $0x18] sm:$0xff] (%p31_p3), %v215_v3  }
  0x14   : > { %220 = vst [vmem:[%s184_s7 + $0x20] sm:$0xff] (%p31_p3), %v219_v4   ;;  %224 = vst [vmem:[%s184_s7 + $0x28] sm:$0xff] (%p31_p3), %v223_v5   ;;  %v227_v6 = vld [vmem:[%s187_s6 + $0x60] sm:$0xff] (%p31_p3)   ;;  %v231_v7 = vld [vmem:[%s187_s6 + $0x68] sm:$0xff] (%p31_p3)  }
  0x15   : > { %v235_v8 = vld [vmem:[%s187_s6 + $0x80] sm:$0xff]   ;;  %228 = vst [vmem:[%s184_s7 + $0x30] sm:$0xff] %v227_v6   ;;  %232 = vst [vmem:[%s184_s7 + $0x38] sm:$0xff] %v231_v7   ;;  %v239_v9 = vld [vmem:[%s187_s6 + $0x88] sm:$0xff]  }
  0x16   : > { %236 = vst [vmem:[%s184_s7 + $0x40] sm:$0xff] %v235_v8   ;;  %240 = vst [vmem:[%s184_s7 + $0x48] sm:$0xff] %v239_v9  }
  0x17 PF: > { %p1200_p5 = scmp.ge.s32.totalorder %s1513_s20, 1  ;;  %p304_p6 = scmp.lt.s32.totalorder %s1513_s20, 3 }
  0x19   : > { %p305_p7 = pnand %p1200_p5, %p304_p6 }
  0x1a   : > { %v346_v10 = vld [vmem:[%s1751_s1] sm:$0xff] (!%p305_p7)  ;;  %v347_v11 = vld [vmem:[%s1751_s1 + $0x8] sm:$0xff] (!%p305_p7)  ;;  %s311_s14 = sand.u32 (!%p305_p7), 1, %s1505_s18   ;;  %v348_v16 = vld [vmem:[%s1751_s1 + $0x10] sm:$0xff] (!%p305_p7)  ;;  %vm450_vm0 = vcmask (!%p305_p7), 523264   ;;  %vm591_vm1 = vcmask (!%p305_p7), 130048  }
  0x1b   : > { %308 = sbr.rel (%p305_p7) target bundleno = 801 (0x321), region = 77  ;;  %v1203_v12 = vld [vmem:[%s1752_s2] ss:$0 sm:$0xff] (!%p305_p7)  ;;  %v349_v17 = vld [vmem:[%s1751_s1 + $0x18] sm:$0xff] (!%p305_p7)  ;;  %v351_v21 = vld [vmem:[%s1751_s1 + $0x28] sm:$0xff] (!%p305_p7) }
  0x1c   : > { %v361_v13 = vmul.f32 (!%p305_p7), %v1203_v12, %v346_v10  ;;  %v362_v14 = vmul.f32 (!%p305_p7), %v1203_v12, %v347_v11  ;;  %v1204_v15 = vld [vmem:[%s1753_s3] ss:$0 sm:$0xff] (!%p305_p7)  ;;  %s1419_s27 = smul.u32 (!%p305_p7), 80, %s311_s14  ;;  %v363_v18 = vmul.f32 (!%p305_p7), %v1203_v12, %v348_v16  ;;  %v364_v19 = vmul.f32 (!%p305_p7), %v1203_v12, %v349_v17  ;;  %v352_v22 = vld [vmem:[%s1751_s1 + $0x30] sm:$0xff] (!%p305_p7)  ;;  %v353_v27 = vld [vmem:[%s1751_s1 + $0x38] sm:$0xff] (!%p305_p7) }
  0x1d   : > { %v350_v20 = vld [vmem:[%s1751_s1 + $0x20] sm:$0xff] (!%p305_p7)  ;;  %v366_v26 = vmul.f32 (!%p305_p7), %v1203_v12, %v351_v21  ;;  %v367_v30 = vmul.f32 (!%p305_p7), %v1203_v12, %v352_v22  ;;  %v368_v31 = vmul.f32 (!%p305_p7), %v1203_v12, %v353_v27 }
  0x1e   : > { %v1609_v23 = vadd.f32 (!%p305_p7), %v1204_v15, %v361_v13  ;;  %v1611_v24 = vadd.f32 (!%p305_p7), %v1204_v15, %v362_v14  ;;  %v365_v25 = vmul.f32 (!%p305_p7), %v1203_v12, %v350_v20  ;;  %v1616_v28 = vadd.f32 (!%p305_p7), %v1204_v15, %v363_v18  ;;  %s1620_s10 = scalar_lea.vmem (!%p305_p7), [#allocation2], %s1419_s27  ;;  %s1201_s27 = sshll.u32 (!%p305_p7), %s1194_s21, 2 }
  0x1f   : > { %v1618_v29 = vadd.f32 (!%p305_p7), %v1204_v15, %v364_v19  ;;  %v1444_v32 = vld [vmem:[%s1620_s10] sm:$0xff] (!%p305_p7)   ;;  %v1625_v36 = vadd.f32 (!%p305_p7), %v1204_v15, %v366_v26  ;;  %v1629_v39 = vadd.f32 (!%p305_p7), %v1204_v15, %v367_v30  ;;  %v1631_v40 = vadd.f32 (!%p305_p7), %v1204_v15, %v368_v31  ;;  %v1446_v26 = vld [vmem:[%s1620_s10 + $0x10] sm:$0xff] (!%p305_p7)   ;;  %v1447_v27 = vld [vmem:[%s1620_s10 + $0x18] sm:$0xff] (!%p305_p7)   ;;  %p340_p8 = scmp.lt.s32.totalorder (!%p305_p7), %s1201_s27, 7 }
  0x20   : > { %v384_v33 = vsub.f32 (!%p305_p7), 0.0, %v1609_v23  ;;  %v385_v34 = vsub.f32 (!%p305_p7), 0.0, %v1611_v24  ;;  %v380_v35 = vadd.f32 (!%p305_p7), %v1204_v15, %v365_v25  ;;  %v386_v37 = vsub.f32 (!%p305_p7), 0.0, %v1616_v28  ;;  %1320 = vmatprep.mubr.msk.bf16.mxu1 (!%p305_p7), %vm450_vm0, %v1444_v32  ;;  %v1445_v25 = vld [vmem:[%s1620_s10 + $0x8] sm:$0xff] (!%p305_p7)   ;;  %v1450_v30 = vld [vmem:[%s1620_s10 + $0x30] sm:$0xff] (!%p305_p7)   ;;  %v1451_v31 = vld [vmem:[%s1620_s10 + $0x38] sm:$0xff] (!%p305_p7)  }
  0x21   : > { %v387_v38 = vsub.f32 (!%p305_p7), 0.0, %v1618_v29  ;;  %v389_v44 = vsub.f32 (!%p305_p7), 0.0, %v1625_v36  ;;  %v390_v47 = vsub.f32 (!%p305_p7), 0.0, %v1629_v39  ;;  %v391_v48 = vsub.f32 (!%p305_p7), 0.0, %v1631_v40  ;;  %v1452_v32 = vld [vmem:[%s1754_s4 + $0x8] sm:$0xff] (!%p305_p7)  }
  0x22   : > { %v392_v41 = vmul.f32 1.442695, %v384_v33  ;;  %v394_v42 = vmul.f32 1.442695, %v385_v34  ;;  %v388_v43 = vsub.f32 0.0, %v380_v35  ;;  %1336 = vmatprep.subr.bf16.mxu0 %v1452_v32  ;;  %v1453_v33 = vld [vmem:[%s1754_s4] sm:$0xff]  }
  0x23   : > { %v396_v45 = vmul.f32 1.442695, %v386_v37  ;;  %v398_v46 = vmul.f32 1.442695, %v387_v38  ;;  %v402_v50 = vmul.f32 1.442695, %v389_v44  ;;  %1337 = vmatpush3.bf16.msra.mxu0 %v1452_v32 }
  0x24   : > { %1459 = vpow2.f32 %v392_v41  ;;  %v400_v49 = vmul.f32 1.442695, %v388_v43  ;;  %v404_v51 = vmul.f32 1.442695, %v390_v47  ;;  %v406_v52 = vmul.f32 1.442695, %v391_v48  ;;  %1342 = vmatprep.subr.bf16.mxu0 %v1453_v33 }
  0x25   : > { %1461 = vpow2.f32 %v394_v42  ;;  %s1760_s27 = smov (!%p340_p8, %s1201_s27), 7 }
  0x26   : > { %1463 = vpow2.f32 %v396_v45  ;;  %s1202_s28 = sshll.u32 %s1760_s27, 3 }
  0x27   : > { %1465 = vpow2.f32 %v398_v46  ;;  %v1454_v46 = vld [vmem:[%s1754_s4 + $0x10] sm:$0xff]   ;;  %s343_s30 = scalar_lea.vmem %s1755_s5, %s1202_s28 }
  0x28   : > { %1467 = vpow2.f32 %v400_v49  ;;  %v1455_v49 = vld [vmem:[%s1754_s4 + $0x18] sm:$0xff]  }
  0x29   : > { %1469 = vpow2.f32 %v402_v50 }
  0x2a   : > { %1471 = vpow2.f32 %v404_v51 }
  0x2b   : > { %1473 = vpow2.f32 %v406_v52 }
  0x2e   : > { %v1460_v53 = vpop.eup %1459 }
  0x2f   : > { %v1462_v54 = vpop.eup %1461  ;;  %v408_v55 = vadd.f32 1.0, %v1460_v53 }
  0x30   : > { %v1464_v56 = vpop.eup %1463  ;;  %v409_v57 = vadd.f32 1.0, %v1462_v54 }
  0x31   : > { %v1466_v58 = vpop.eup %1465  ;;  %1475 = vrcp.f32 %v408_v55  ;;  %v410_v59 = vadd.f32 1.0, %v1464_v56 }
  0x32   : > { %v1468_v60 = vpop.eup %1467  ;;  %1477 = vrcp.f32 %v409_v57  ;;  %v411_v61 = vadd.f32 1.0, %v1466_v58 }
  0x33   : > { %v1470_v62 = vpop.eup %1469  ;;  %1479 = vrcp.f32 %v410_v59  ;;  %v412_v63 = vadd.f32 1.0, %v1468_v60  ;;  %v1456_v60 = vld [vmem:[%s1620_s10 + $0x40] sm:$0xff]  }
  0x34   : > { %v1472_v0 = vpop.eup %1471  ;;  %1481 = vrcp.f32 %v411_v61  ;;  %v413_v1 = vadd.f32 1.0, %v1470_v62  ;;  %v1458_v61 = vld [vmem:[%s1754_s4 + $0x20] sm:$0xff]  }
  0x35   : > { %v1474_v2 = vpop.eup %1473  ;;  %1483 = vrcp.f32 %v412_v63  ;;  %v414_v3 = vadd.f32 1.0, %v1472_v0  ;;  %v1457_v62 = vld [vmem:[%s1620_s10 + $0x48] sm:$0xff]  }
  0x36   : > { %1485 = vrcp.f32 %v413_v1  ;;  %v415_v4 = vadd.f32 1.0, %v1474_v2 }
  0x37   : > { %1487 = vrcp.f32 %v414_v3 }
  0x38   : > { %1489 = vrcp.f32 %v415_v4 }
  0x3b   : > { %v1476_v5 = vpop.eup %1475 }
  0x3c   : > { %v1478_v6 = vpop.eup %1477  ;;  %v424_v7 = vmul.f32 %v1476_v5, %v1609_v23 }
  0x3d   : > { %v1480_v8 = vpop.eup %1479  ;;  %v425_v9 = vmul.f32 %v1478_v6, %v1611_v24 }
  0x3e   : > { %v1482_v10 = vpop.eup %1481  ;;  %v426_v11 = vmul.f32 %v1480_v8, %v1616_v28  ;;  %v1448_v28 = vld [vmem:[%s1620_s10 + $0x20] sm:$0xff]  }
  0x3f   : > { %v1484_v12 = vpop.eup %1483  ;;  %v1640_v13 = vpack.c.bf16 %v425_v9, %v424_v7  ;;  %v427_v14 = vmul.f32 %v1482_v10, %v1618_v29  ;;  %v1449_v29 = vld [vmem:[%s1620_s10 + $0x28] sm:$0xff]  }
  0x40   : > { %v1486_v15 = vpop.eup %1485  ;;  %v428_v16 = vmul.f32 %v1484_v12, %v380_v35 }
  0x41   : > { %v1488_v17 = vpop.eup %1487  ;;  %1312 = vmatprep.subr.bf16.mxu1 %v1640_v13  ;;  %v1644_v18 = vpack.c.bf16 %v427_v14, %v426_v11  ;;  %v429_v19 = vmul.f32 %v1486_v15, %v1625_v36 }
  0x42   : > { %v1490_v20 = vpop.eup %1489  ;;  %1313 = vmatpush3.bf16.msra.mxu1 %v1640_v13  ;;  %v430_v22 = vmul.f32 %v1488_v17, %v1629_v39 }
  0x43   : > { %1314 = vmatprep.subr.bf16.mxu1 %v1644_v18  ;;  %v1649_v21 = vpack.c.bf16 %v429_v19, %v428_v16  ;;  %v431_v23 = vmul.f32 %v1490_v20, %v1631_v40 }
  0x45   : > { %v1655_v24 = vpack.c.bf16 %v431_v23, %v430_v22 }
  0x46   : > { %1315 = vmatpush3.bf16.msra.mxu1 %v1644_v18 }
  0x47   : > { %1316 = vmatprep.subr.bf16.mxu1 %v1649_v21 }
  0x4a   : > { %1317 = vmatpush3.bf16.msra.mxu1 %v1649_v21 }
  0x4b   : > { %1318 = vmatprep.subr.bf16.mxu1 %v1655_v24 }
  0x4e   : > { %1319 = vmatpush3.bf16.msra.mxu1 %v1655_v24 }
  0x4f   : > { %1324 = vmatprep.subr.bf16.mxu1 %v1640_v13 }
  0x51   : > { %1321 = vmatmul.mubr.msk.bf16.vlgmr.msra.gmra.mrb[0].mxu1 %vm450_vm0, %v1445_v25 }
  0x52   : > { %1325 = vmatpush3.bf16.msra.mxu1 %v1640_v13  ;;  %1332 = vmatprep.mubr.msk.bf16.mxu1 %vm450_vm0, %v1446_v26 }
  0x53   : > { %1326 = vmatprep.subr.bf16.mxu1 %v1644_v18 }
  0x56   : > { %1327 = vmatpush3.bf16.msra.mxu1 %v1644_v18 }
  0x57   : > { %1328 = vmatprep.subr.bf16.mxu1 %v1649_v21 }
  0x5a   : > { %1329 = vmatpush3.bf16.msra.mxu1 %v1649_v21 }
  0x5b   : > { %1330 = vmatprep.subr.bf16.mxu1 %v1655_v24 }
  0x5e   : > { %1331 = vmatpush3.bf16.msra.mxu1 %v1655_v24 }
  0x5f   : > { %1348 = vmatprep.subr.bf16.mxu1 %v1640_v13 }
  0x61   : > { %1333 = vmatmul.mubr.msk.bf16.vlgmr.msra.gmra.mrb[4].mxu1 %vm450_vm0, %v1447_v27 }
  0x62   : > { %1349 = vmatpush3.bf16.msra.mxu1 %v1640_v13  ;;  %1356 = vmatprep.mubr.msk.bf16.mxu1 %vm450_vm0, %v1448_v28 }
  0x63   : > { %1350 = vmatprep.subr.bf16.mxu1 %v1644_v18 }
  0x66   : > { %1351 = vmatpush3.bf16.msra.mxu1 %v1644_v18 }
  0x67   : > { %1352 = vmatprep.subr.bf16.mxu1 %v1649_v21 }
  0x6a   : > { %1353 = vmatpush3.bf16.msra.mxu1 %v1649_v21 }
  0x6b   : > { %1354 = vmatprep.subr.bf16.mxu1 %v1655_v24 }
  0x6e   : > { %1355 = vmatpush3.bf16.msra.mxu1 %v1655_v24 }
  0x6f   : > { %1366 = vmatprep.subr.bf16.mxu1 %v1640_v13 }
  0x71   : > { %1357 = vmatmul.mubr.msk.bf16.vlgmr.msra.gmra.mrb[8].mxu1 %vm450_vm0, %v1449_v29 }
  0x72   : > { %1367 = vmatpush3.bf16.msra.mxu1 %v1640_v13  ;;  %1374 = vmatprep.mubr.msk.bf16.mxu1 %vm450_vm0, %v1450_v30 }
  0x73   : > { %1368 = vmatprep.subr.bf16.mxu1 %v1644_v18 }
  0x76   : > { %1369 = vmatpush3.bf16.msra.mxu1 %v1644_v18 }
  0x77   : > { %1370 = vmatprep.subr.bf16.mxu1 %v1649_v21 }
  0x7a   : > { %1371 = vmatpush3.bf16.msra.mxu1 %v1649_v21 }
  0x7b   : > { %1372 = vmatprep.subr.bf16.mxu1 %v1655_v24 }
  0x7e   : > { %1373 = vmatpush3.bf16.msra.mxu1 %v1655_v24 }
  0x81   : > { %1375 = vmatmul.mubr.msk.bf16.vlgmr.msra.gmra.mrb[12].mxu1 %vm450_vm0, %v1451_v31 }
 0x124   : > { %v1322_v34 = vpop.f32.mrb[0].mxu1 }
 0x125   : > { %v491_v35 = vpop.f32.mrb[1].mxu1 }
 0x126   : > { %v1323_v36 = vpop.f32.mrb[2].mxu1 }
 0x127   : > { %v507_v37 = vpack.c.bf16 %v1323_v36, %v1322_v34  ;;  %v494_v38 = vpop.f32.mrb[3].mxu1 }
 0x128   : > { %v506_v39 = vpack.c.bf16 %v494_v38, %v491_v35 }
 0x134   : > { %v1334_v40 = vpop.f32.mrb[4].mxu1 }
 0x135   : > { %v565_v41 = vpop.f32.mrb[5].mxu1 }
 0x136   : > { %v1335_v42 = vpop.f32.mrb[6].mxu1 }
 0x137   : > { %v581_v43 = vpack.c.bf16 %v1335_v42, %v1334_v40  ;;  %v568_v44 = vpop.f32.mrb[7].mxu1 }
 0x138   : > { %v580_v45 = vpack.c.bf16 %v568_v44, %v565_v41 }
 0x13a   : > { %1338 = vmatprep.mubr.msk.bf16.mxu0 %vm591_vm1, %v580_v45 }
 0x13b   : > { %1339 = vmatmul.mubr.msk.bf16.vlgmr.msra.gmra.mrb[0].mxu0 %vm591_vm1, %v581_v43 }
 0x13c   : > { %1343 = vmatpush3.bf16.msra.mxu0 %v1453_v33  ;;  %1344 = vmatprep.mubr.msk.bf16.mxu0 %vm591_vm1, %v506_v39 }
 0x13d   : > { %1360 = vmatprep.subr.bf16.mxu0 %v1454_v46 }
 0x144   : > { %v1358_v47 = vpop.f32.mrb[8].mxu1 }
 0x145   : > { %v763_v48 = vpop.f32.mrb[9].mxu1 }
 0x146   : > { %v1359_v50 = vpop.f32.mrb[10].mxu1 }
 0x147   : > { %1345 = vmatmul.mubr.msk.bf16.vlgmr.msra.gmra.mrb[0].mxu0 %vm591_vm1, %v507_v37  ;;  %v779_v51 = vpack.c.bf16 %v1359_v50, %v1358_v47  ;;  %v766_v52 = vpop.f32.mrb[11].mxu1 }
 0x148   : > { %1361 = vmatpush3.bf16.msra.mxu0 %v1454_v46  ;;  %v778_v53 = vpack.c.bf16 %v766_v52, %v763_v48 }
 0x149   : > { %1378 = vmatprep.subr.bf16.mxu0 %v1455_v49 }
 0x14a   : > { %1362 = vmatprep.mubr.msk.bf16.mxu0 %vm591_vm1, %v778_v53 }
 0x153   : > { %1363 = vmatmul.mubr.msk.bf16.vlgmr.msra.gmra.mrb[0].mxu0 %vm591_vm1, %v779_v51 }
 0x154   : > { %1379 = vmatpush3.bf16.msra.mxu0 %v1455_v49  ;;  %v1376_v54 = vpop.f32.mrb[12].mxu1 }
 0x155   : > { %v903_v55 = vpop.f32.mrb[13].mxu1  ;;  %1384 = vmatprep.subr.bf16.mxu0 %v1640_v13 }
 0x156   : > { %v1377_v56 = vpop.f32.mrb[14].mxu1 }
 0x157   : > { %v919_v57 = vpack.c.bf16 %v1377_v56, %v1376_v54  ;;  %v906_v58 = vpop.f32.mrb[15].mxu1 }
 0x158   : > { %v918_v59 = vpack.c.bf16 %v906_v58, %v903_v55 }
 0x15a   : > { %1380 = vmatprep.mubr.msk.bf16.mxu0 %vm591_vm1, %v918_v59 }
 0x15f   : > { %1381 = vmatmul.mubr.msk.bf16.vlgmr.msra.gmra.mrb[0].mxu0 %vm591_vm1, %v919_v57 }
 0x160   : > { %1385 = vmatpush3.bf16.msra.mxu0 %v1640_v13  ;;  %1392 = vmatprep.mubr.msk.bf16.mxu0 %vm450_vm0, %v1456_v60 }
 0x161   : > { %1386 = vmatprep.subr.bf16.mxu0 %v1644_v18 }
 0x164   : > { %1387 = vmatpush3.bf16.msra.mxu0 %v1644_v18 }
 0x165   : > { %1388 = vmatprep.subr.bf16.mxu0 %v1649_v21 }
 0x168   : > { %1389 = vmatpush3.bf16.msra.mxu0 %v1649_v21 }
 0x169   : > { %1390 = vmatprep.subr.bf16.mxu0 %v1655_v24 }
 0x16c   : > { %1391 = vmatpush3.bf16.msra.mxu0 %v1655_v24 }
 0x16d   : > { %1396 = vmatprep.subr.bf16.mxu0 %v1458_v61 }
 0x16f   : > { %1393 = vmatmul.mubr.msk.bf16.vlgmr.msra.gmra.mrb[4].mxu0 %vm450_vm0, %v1457_v62 }
 0x170   : > { %1397 = vmatpush3.bf16.msra.mxu0 %v1458_v61 }
 0x242   : > { %v1394_v63 = vpop.f32.mrb[4].mxu0 }
 0x243   : > { %v1043_v0 = vpop.f32.mrb[5].mxu0 }
 0x244   : > { %v1395_v1 = vpop.f32.mrb[6].mxu0 }
 0x245   : > { %v1059_v2 = vpack.c.bf16 %v1395_v1, %v1394_v63  ;;  %v1046_v3 = vpop.f32.mrb[7].mxu0 }
 0x246   : > { %v1058_v4 = vpack.c.bf16 %v1046_v3, %v1043_v0 }
 0x248   : > { %1398 = vmatprep.mubr.msk.bf16.mxu0 %vm591_vm1, %v1058_v4 }
 0x249   : > { %1399 = vmatmul.mubr.msk.bf16.vlgmr.msra.gmra.mrb[0].mxu0 %vm591_vm1, %v1059_v2 }
 0x31c   : > { %v1400_v5 = vpop.f32.mrb[0].mxu0 }
 0x31d   : > { %v1109_v6 = vpop.f32.mrb[1].mxu0  ;;  %1130 = vst [vmem:[%s343_s30 + $0x10] sm:$0xff] %v1400_v5 }
 0x31e   : > { %1128 = vst [vmem:[%s343_s30] sm:$0xff] %v1109_v6  ;;  %v1401_v7 = vpop.f32.mrb[2].mxu0 }
 0x31f   : > { %v1112_v8 = vpop.f32.mrb[3].mxu0  ;;  %1131 = vst [vmem:[%s343_s30 + $0x18] sm:$0xff] %v1401_v7 }
 0x320   : > { %1129 = vst [vmem:[%s343_s30 + $0x8] sm:$0xff] %v1112_v8 }
 0x321 PF: > { %p12_p9 = scmp.ge.s32.totalorder %s1562_s22, 4   ;;  %s1756_s18 = smov %s1509_s19 }
 0x322   : > { %s1757_s19 = smov %s1571_s25  ;;  %s1758_s20 = smov %s1562_s22 }
 0x323   :  { %14 = sbr.rel (!%p12_p9) target bundleno = 2 (0x2), region = 124 }

</bundles_post_ra>
